<compile_context>
chip_gen: v6e
topology: v6e:2x2x1
jax: 0.10.0
libtpu: 0.0.40
codegen_flags: <defaults>
</compile_context>

<pallas_src>
import functools

import jax
import jax.numpy as jnp
from jax.experimental import pallas as pl
from jax.experimental.pallas import tpu as pltpu


def _sigmoid_f32(z):
    # Single EUP op (tanh) + cheap VPU mul/add; exact (no approx reciprocal).
    return 0.5 * jnp.tanh(0.5 * z) + 0.5


def autoencoder_kernel(x_ref, wg_ref, bg_ref, wh_ref, bh_ref, o_ref):
    # Cast to bf16 on the VPU here instead of a separate XLA pass over HBM.
    x = x_ref[...].astype(jnp.bfloat16)                                # (TB, Q)
    h = jnp.dot(x, wg_ref[...], preferred_element_type=jnp.float32)    # (TB, Kp) f32 acc
    h = _sigmoid_f32(h + bg_ref[...])                                  # f32 epilogue
    y = jnp.dot(h.astype(jnp.bfloat16), wh_ref[...],
                preferred_element_type=jnp.float32)                    # (TB, Q) f32 acc
    o_ref[...] = _sigmoid_f32(y + bh_ref[...]).astype(o_ref.dtype)


def prepare_params(wg, bg, wh, bh):
    """One-time weight prep: pad latent dim to a 128-lane multiple and cast to bf16.

    Padded h-layer columns produce sigmoid(0+0)=0.5 latents but multiply all-zero
    rows of Wh, so the padding is mathematically inert.
    """
    Q, K = wg.shape
    Kp = 128 * pl.cdiv(K, 128)
    wg_p = jnp.pad(wg, ((0, 0), (0, Kp - K))).astype(jnp.bfloat16)   # (Q, Kp)
    bg_p = jnp.pad(bg, ((0, 0), (0, Kp - K)))                         # (1, Kp) f32
    wh_p = jnp.pad(wh, ((0, Kp - K), (0, 0))).astype(jnp.bfloat16)   # (Kp, Q)
    return wg_p, bg_p, wh_p, bh


def _auto_tile(B):
    """Batch tile: >=2 grid steps when possible (feeds both v7x TCs), tiles up
    to 1024 rows for HBM-roofline efficiency on large batches."""
    if B <= 8:
        return 8
    return min(1024, 8 * pl.cdiv(pl.cdiv(B, 2), 8))


@functools.partial(jax.jit, static_argnames=("tb", "out_dtype"))
def autoencoder_forward(x, wg_bf, bg, wh_bf, bh, *, tb=None, out_dtype=jnp.float32):
    """Forward pass of the AutoEncoder.

    x:     (B, Q)  f32 user vectors (cast to bf16 inside the kernel)
    wg_bf: (Q, Kp) bf16 (transposed vs. torch g.weight, K-padded)
    bg:    (1, Kp) f32
    wh_bf: (Kp, Q) bf16 (transposed vs. torch h.weight, K-padded)
    bh:    (1, Q)  f32
    """
    B, Q = x.shape
    Kp = wg_bf.shape[1]

    if tb is None:
        tb = _auto_tile(B)

    # Pad batch to a multiple of the tile (padded rows are discarded at the end).
    Bp = tb * pl.cdiv(B, tb)
    x_p = jnp.pad(x, ((0, Bp - B), (0, 0)))

    out_bytes = jnp.dtype(out_dtype).itemsize

    # VMEM budget: double-buffered x/out tiles + resident weights + headroom
    # for f32 intermediates.  Capped at 64 MiB (v7x physical VMEM); v5e/v6e
    # have 128 MiB so this never over-constrains them for these tile sizes.
    vmem_need = (2 * tb * Q * 4
                 + 2 * tb * Q * out_bytes
                 + 2 * (Q * Kp + Kp * Q) * 2
                 + 2 * (Kp + Q) * 4
                 + 2 * tb * max(Kp, Q) * 4)
    vmem_limit = min(64 * 1024 * 1024, max(32 * 1024 * 1024, int(vmem_need * 1.25)))

    cost = pl.CostEstimate(
        flops=4 * Bp * Q * Kp,                      # two matmuls, 2*M*N*K each
        transcendentals=Bp * (Kp + Q),              # one tanh per sigmoid element
        bytes_accessed=(Bp * Q * 4                  # x (f32 in)
                        + (Q * Kp + Kp * Q) * 2     # bf16 weights
                        + (Kp + Q) * 4              # biases
                        + Bp * Q * out_bytes),      # output
    )

    out = pl.pallas_call(
        autoencoder_kernel,
        out_shape=jax.ShapeDtypeStruct((Bp, Q), out_dtype),
        grid_spec=pltpu.PrefetchScalarGridSpec(
            num_scalar_prefetch=0,
            grid=(Bp // tb,),
            in_specs=[
                pl.BlockSpec((tb, Q), lambda i: (i, 0)),   # x tile  (pipelined)
                pl.BlockSpec((Q, Kp), lambda i: (0, 0)),   # Wg      (VMEM-resident)
                pl.BlockSpec((1, Kp), lambda i: (0, 0)),   # bg      (VMEM-resident)
                pl.BlockSpec((Kp, Q), lambda i: (0, 0)),   # Wh      (VMEM-resident)
                pl.BlockSpec((1, Q), lambda i: (0, 0)),    # bh      (VMEM-resident)
            ],
            out_specs=pl.BlockSpec((tb, Q), lambda i: (i, 0)),
        ),
        compiler_params=pltpu.CompilerParams(
            dimension_semantics=("parallel",),   # 2 TCs on v7x; no-op on v5e/v6e
            vmem_limit_bytes=vmem_limit,
        ),
        cost_estimate=cost,
    )(x_p, wg_bf, bg, wh_bf, bh)

    return out[:B]


def init_params(key, num_question, k):
    """Deterministic init mimicking torch.nn.Linear (uniform +-1/sqrt(fan_in))."""
    kg_w, kg_b, kh_w, kh_b = jax.random.split(key, 4)
    bound_g = 1.0 / jnp.sqrt(num_question)
    bound_h = 1.0 / jnp.sqrt(k)
    # Stored transposed relative to PyTorch's (out, in) convention.
    wg = jax.random.uniform(kg_w, (num_question, k), jnp.float32, -bound_g, bound_g)
    bg = jax.random.uniform(kg_b, (1, k), jnp.float32, -bound_g, bound_g)
    wh = jax.random.uniform(kh_w, (k, num_question), jnp.float32, -bound_h, bound_h)
    bh = jax.random.uniform(kh_b, (1, num_question), jnp.float32, -bound_h, bound_h)
    return wg, bg, wh, bh


if __name__ == "__main__":
    key = jax.random.PRNGKey(0)
    num_question = 256   # synthetic "num_question"
    k = 100              # default latent size from the module signature
    batch = 512          # auto-tiles to 2 grid steps of 256 rows

    k_x, k_p = jax.random.split(key)
    x = jax.random.uniform(k_x, (batch, num_question), jnp.float32)  # user vectors
    wg, bg, wh, bh = init_params(k_p, num_question, k)

    # One-time weight prep (pad + bf16 cast) outside the per-call forward.
    wg_bf, bg_p, wh_bf, bh_p = prepare_params(wg, bg, wh, bh)

    out = autoencoder_forward(x, wg_bf, bg_p, wh_bf, bh_p)
    out = jax.block_until_ready(out)

    # Pure-JAX full-precision reference of the module forward.
    ref = jax.nn.sigmoid(jax.nn.sigmoid(x @ wg + bg) @ wh + bh)
    assert out.shape == (batch, num_question)
    # bf16 matmul inputs -> bf16-appropriate tolerance (sigmoid itself is exact now).
    err = float(jnp.max(jnp.abs(out - ref)))
    assert jnp.allclose(out, ref, atol=1e-2, rtol=0.0), f"max abs err {err}"

    print("KERNEL_OK")
</pallas_src>

<mosaic_0001>
module attributes {stable_mosaic.version = 11 : i64} {
  func.func @autoencoder_kernel(%arg0: i32, %arg1: memref<256x256xf32, #tpu.memory_space<vmem>>, %arg2: memref<256x128xbf16, #tpu.memory_space<vmem>>, %arg3: memref<1x128xf32, #tpu.memory_space<vmem>>, %arg4: memref<128x256xbf16, #tpu.memory_space<vmem>>, %arg5: memref<1x256xf32, #tpu.memory_space<vmem>>, %arg6: memref<256x256xf32, #tpu.memory_space<vmem>>) attributes {dimension_semantics = [#tpu.dimension_semantics<parallel>], iteration_bounds = array<i64: 2>, scalar_prefetch = 0 : i64, scratch_operands = 0 : i64, tpu.core_type = #tpu.core_type<tc>, window_params = [{transform_indices = @transform_0, window_bounds = array<i64: 256, 256>}, {pipeline_mode = #tpu.pipeline_mode<synchronous>, transform_indices = @transform_1, window_bounds = array<i64: 256, 128>}, {pipeline_mode = #tpu.pipeline_mode<synchronous>, transform_indices = @transform_2, window_bounds = array<i64: 1, 128>}, {pipeline_mode = #tpu.pipeline_mode<synchronous>, transform_indices = @transform_3, window_bounds = array<i64: 128, 256>}, {pipeline_mode = #tpu.pipeline_mode<synchronous>, transform_indices = @transform_4, window_bounds = array<i64: 1, 256>}, {transform_indices = @transform_5, window_bounds = array<i64: 256, 256>}]} {
    %c0 = arith.constant 0 : index
    %c0_0 = arith.constant 0 : index
    %0 = vector.load %arg1[%c0, %c0_0] : memref<256x256xf32, #tpu.memory_space<vmem>>, vector<256x256xf32>
    %1 = arith.truncf %0 : vector<256x256xf32> to vector<256x256xbf16>
    %c0_1 = arith.constant 0 : index
    %c0_2 = arith.constant 0 : index
    %2 = vector.load %arg2[%c0_1, %c0_2] : memref<256x128xbf16, #tpu.memory_space<vmem>>, vector<256x128xbf16>
    %cst = arith.constant dense<0.000000e+00> : vector<256x128xf32>
    %3 = tpu.matmul %1, %2, %cst {dimension_numbers = #tpu.dot_dimension_numbers<[1], [0], [0], [1], [0, 0, 1, 1], [], []>} : vector<256x256xbf16>, vector<256x128xbf16>, vector<256x128xf32> -> vector<256x128xf32>
    %c0_3 = arith.constant 0 : index
    %c0_4 = arith.constant 0 : index
    %4 = vector.load %arg3[%c0_3, %c0_4] : memref<1x128xf32, #tpu.memory_space<vmem>>, vector<1x128xf32>
    %5 = vector.broadcast %4 : vector<1x128xf32> to vector<256x128xf32>
    %6 = arith.addf %3, %5 : vector<256x128xf32>
    %cst_5 = arith.constant 5.000000e-01 : f32
    %7 = vector.broadcast %cst_5 : f32 to vector<256x128xf32>
    %8 = arith.mulf %7, %6 : vector<256x128xf32>
    %9 = math.tanh %8 : vector<256x128xf32>
    %cst_6 = arith.constant 5.000000e-01 : f32
    %10 = vector.broadcast %cst_6 : f32 to vector<256x128xf32>
    %11 = arith.mulf %10, %9 : vector<256x128xf32>
    %cst_7 = arith.constant 5.000000e-01 : f32
    %12 = vector.broadcast %cst_7 : f32 to vector<256x128xf32>
    %13 = arith.addf %11, %12 : vector<256x128xf32>
    %14 = arith.truncf %13 : vector<256x128xf32> to vector<256x128xbf16>
    %c0_8 = arith.constant 0 : index
    %c0_9 = arith.constant 0 : index
    %15 = vector.load %arg4[%c0_8, %c0_9] : memref<128x256xbf16, #tpu.memory_space<vmem>>, vector<128x256xbf16>
    %cst_10 = arith.constant dense<0.000000e+00> : vector<256x256xf32>
    %16 = tpu.matmul %14, %15, %cst_10 {dimension_numbers = #tpu.dot_dimension_numbers<[1], [0], [0], [1], [0, 0, 1, 1], [], []>} : vector<256x128xbf16>, vector<128x256xbf16>, vector<256x256xf32> -> vector<256x256xf32>
    %c0_11 = arith.constant 0 : index
    %c0_12 = arith.constant 0 : index
    %17 = vector.load %arg5[%c0_11, %c0_12] : memref<1x256xf32, #tpu.memory_space<vmem>>, vector<1x256xf32>
    %18 = vector.broadcast %17 : vector<1x256xf32> to vector<256x256xf32>
    %19 = arith.addf %16, %18 : vector<256x256xf32>
    %cst_13 = arith.constant 5.000000e-01 : f32
    %20 = vector.broadcast %cst_13 : f32 to vector<256x256xf32>
    %21 = arith.mulf %20, %19 : vector<256x256xf32>
    %22 = math.tanh %21 : vector<256x256xf32>
    %cst_14 = arith.constant 5.000000e-01 : f32
    %23 = vector.broadcast %cst_14 : f32 to vector<256x256xf32>
    %24 = arith.mulf %23, %22 : vector<256x256xf32>
    %cst_15 = arith.constant 5.000000e-01 : f32
    %25 = vector.broadcast %cst_15 : f32 to vector<256x256xf32>
    %26 = arith.addf %24, %25 : vector<256x256xf32>
    %c0_16 = arith.constant 0 : index
    %c0_17 = arith.constant 0 : index
    %27 = vector.load %arg6[%c0_16, %c0_17] : memref<256x256xf32, #tpu.memory_space<vmem>>, vector<256x256xf32>
    tpu.vector_store %arg6[%c0_16, %c0_17], %26 {strides = array<i32>} : memref<256x256xf32, #tpu.memory_space<vmem>>, vector<256x256xf32>,
    return
  }
  func.func @transform_0(%arg0: i32) -> (i32, i32) {
    %c0_i32 = arith.constant 0 : i32
    %c0_i32_0 = arith.constant 0 : i32
    return %arg0, %c0_i32 : i32, i32
  }
  func.func @transform_1(%arg0: i32) -> (i32, i32) {
    %c0_i32 = arith.constant 0 : i32
    %c0_i32_0 = arith.constant 0 : i32
    %c0_i32_1 = arith.constant 0 : i32
    return %c0_i32, %c0_i32_0 : i32, i32
  }
  func.func @transform_2(%arg0: i32) -> (i32, i32) {
    %c0_i32 = arith.constant 0 : i32
    %c0_i32_0 = arith.constant 0 : i32
    %c0_i32_1 = arith.constant 0 : i32
    return %c0_i32, %c0_i32_0 : i32, i32
  }
  func.func @transform_3(%arg0: i32) -> (i32, i32) {
    %c0_i32 = arith.constant 0 : i32
    %c0_i32_0 = arith.constant 0 : i32
    %c0_i32_1 = arith.constant 0 : i32
    return %c0_i32, %c0_i32_0 : i32, i32
  }
  func.func @transform_4(%arg0: i32) -> (i32, i32) {
    %c0_i32 = arith.constant 0 : i32
    %c0_i32_0 = arith.constant 0 : i32
    %c0_i32_1 = arith.constant 0 : i32
    return %c0_i32, %c0_i32_0 : i32, i32
  }
  func.func @transform_5(%arg0: i32) -> (i32, i32) {
    %c0_i32 = arith.constant 0 : i32
    %c0_i32_0 = arith.constant 0 : i32
    return %arg0, %c0_i32 : i32, i32
  }
}

</mosaic_0001>

<bundles_post_ra>
// kernel: autoencoder_forward.1
= control target key start
LH: loop header
LB: loop body
LE: loop exit
PB: predicated region body
PF: predicated region fallthrough
CT: control target
= control target key end

     0   :  { %10 = vsyncpa [#allocation3], 0  ;;  %s2659_s0 = inlined_call_operand.hbm [shape: f32[512,256], index: 0, kind: input, shape index: {}]   ;;  %s2660_s1 = inlined_call_operand.hbm [shape: bf16[256,128], index: 1, kind: input, shape index: {}]   ;;  %s2661_s2 = inlined_call_operand.vmem [shape: f32[1,128], index: 2, kind: input, shape index: {}]   ;;  %s2662_s3 = inlined_call_operand.hbm [shape: bf16[128,256], index: 3, kind: input, shape index: {}]   ;;  %s2663_s4 = inlined_call_operand.vmem [shape: f32[1,256], index: 4, kind: input, shape index: {}]   ;;  %s2664_s5 = inlined_call_operand.hbm [shape: f32[512,256], index: 5, kind: output, shape index: {}]  }
   0x1   :  { %12 = vsyncpa [#allocation3 + $0x1], 0 }
   0x2   :  { %13 = vsyncpa [#allocation6], 0 }
   0x3   :  { %14 = vsyncpa [#allocation4], 0 }
   0x4   :  { %16 = vsyncpa [#allocation4 + $0x1], 0  ;;  %s2210_s18 = smov 0   ;;  %s2212_s19 = smov 0  }
   0x5   :  { %s2214_s20 = smov 0   ;;  %s2216_s21 = smov 0  }
   0x6 LB: > { %s2231_s22 = sadd.s32 4294967295, %s2165_s21   ;;  %s1540_s23 = sadd.s32 4294967294, %s2165_s21   ;;  %s2165_s21 = sphi %s2216_s21, %s2686_s21   ;;  %s2161_s20 = sphi %s2214_s20, %s2685_s20   ;;  %s2157_s19 = sphi %s2212_s19, %s2684_s19   ;;  %s2153_s18 = sphi %s2210_s18, %s2683_s18  }
   0x7   : > { %p42_p0 = scmp.ne.s32.totalorder %s2157_s19, %s2153_s18  ;;  %p2665_p1 = scmp.eq.s32.totalorder %s2231_s22, 0 }
   0x8   : > { %p156_p3 = scmp.eq.s32.totalorder %s1540_s23, 1  ;;  %p1541_p5 = scmp.ge.s32.totalorder %s2165_s21, 1 }
   0x9   : > { %p2240_p4 = por %p2665_p1, %p42_p0  ;;  %p163_p7 = scmp.lt.s32.totalorder %s2165_s21, 3 }
   0xa   : > { %p2245_p6 = por %p156_p3, %p42_p0  ;;  %s2167_s27 = smov [#allocation5]  }
   0xb   : > { %s2669_s24 = scalar_select %p2240_p4, 1, 0 }
   0xc   : > { %s2670_s25 = scalar_select %p2245_p6, 1, 0 }
   0xd   : > { %p2250_p8 = pnand %p1541_p5, %p163_p7  ;;  %s175_s28 = sshll.u32 %s2167_s27, 4  ;;  %s176_s28 = int_to_ptr.vmem [resolvable:$true] %s175_s28 }
   0xe   : > { %s2168_s30 = smov [#allocation7]   ;;  %s2028_s7 = scalar_lea.vmem %s176_s28, 2048 }
   0xf   : > { %s2671_s26 = scalar_select %p2250_p8, 1, 0 }
  0x10   : > { %p1721_p9 = pneg %p2250_p8  ;;  %s191_s6 = sshll.u32 %s2168_s30, 4  ;;  %s192_s6 = int_to_ptr.vmem [resolvable:$true] %s191_s6 }
  0x11   : > { %p2029_p13 = scmp.ne.s32.totalorder %s176_s28, %s2028_s7  ;;  %p2036_p5 = scmp.lt.s32.totalorder %s176_s28, %s176_s28 }
  0x12   : > { %p2259_p11 = pnand %p1721_p9, %p2665_p1  ;;  %p2037_p7 = scmp.lt.s32.totalorder %s2028_s7, %s2028_s7 }
  0x14   : > { %p2019_p12 = pneg %p2259_p11  ;;  %p2038_p10 = por %p2037_p7, %p2036_p5 }
  0x16   : > { %p2031_p0 = pnand %p2029_p13, %p2019_p12 }
  0x18   : > { %p2032_p3 = pneg %p2031_p0 }
  0x1a   : > { %p2039_p9 = pnand %p2038_p10, %p2032_p3 }
  0x1c   : > { %2042 = shalt.err (!%p2039_p9)
}
  0x1d   : > { %s2169_s8 = smov 64   ;;  %s2170_s9 = smov 4  }
  0x1e   : > { %1724 = dma.hbm_to_vmem [thread:$0]  (!%p2259_p11), %s2660_s1, 2048, %s176_s28, [#allocation6], %s2169_s8, %s2169_s8, %s2170_s9  }
  0x1f   : > { %s2054_s12 = scalar_lea.vmem %s192_s6, 2048  ;;  %p2062_p2 = scmp.lt.s32.totalorder %s192_s6, %s192_s6 }
  0x20   : > { %p2055_p1 = scmp.ne.s32.totalorder %s192_s6, %s2054_s12  ;;  %p2063_p6 = scmp.lt.s32.totalorder %s2054_s12, %s2054_s12 }
  0x22   : > { %p2057_p13 = pnand %p2055_p1, %p2019_p12  ;;  %p2064_p5 = por %p2063_p6, %p2062_p2 }
  0x24   : > { %p2058_p0 = pneg %p2057_p13 }
  0x26   : > { %p2065_p10 = pnand %p2064_p5, %p2058_p0 }
  0x28   : > { %2068 = shalt.err (!%p2065_p10)
}
  0x29   : > { %s2171_s13 = smov 128   ;;  %s2172_s14 = smov 8  }
  0x2a   : > { %1727 = dma.hbm_to_vmem [thread:$0]  (!%p2259_p11), %s2662_s3, 2048, %s192_s6, [#allocation6], %s2171_s13, %s2171_s13, %s2172_s14  }
  0x2b   : > { %s2282_s17 = sadd.s32 1, %s2165_s21   ;;  %s29_s27 = sadd.s32 1, %s2161_s20 }
  0x2c   : > { %s26_s23 = ssub.s32 %s2165_s21, %s2282_s17  ;;  %p36_p2 = scmp.ne.s32.totalorder %s2161_s20, %s2157_s19 }
  0x2d   : > { %p27_p1 = scmp.eq.s32.totalorder %s26_s23, 0  ;;  %p37_p6 = scmp.eq.s32.totalorder %s2165_s21, 0 }
  0x2e   : > { %p2673_p3 = scmp.eq.s32.totalorder %s2231_s22, 1  ;;  %p1738_p9 = scmp.lt.s32.totalorder %s2165_s21, 2 }
  0x2f   : > { %s2291_s28 = scalar_select %p27_p1, %s2161_s20, %s29_s27  }
  0x30   : > { %p38_p12 = por %p37_p6, %p36_p2  ;;  %p2295_p7 = por %p2673_p3, %p36_p2 }
  0x31   : > { %s208_s29 = sand.u32 1, %s2161_s20   ;;  %s1594_s6 = sshll.u32 %s2165_s21, 13 }
  0x32   : > { %s2674_s30 = scalar_select %p2295_p7, 1, 0 }
  0x33   : > { %s1545_s7 = sshll.u32 %s208_s29, 9  ;;  %s2305_s10 = scalar_lea.hbm %s2659_s0, %s1594_s6 }
  0x34   : > { %s212_s11 = scalar_lea.vmem [#allocation2], %s1545_s7  ;;  %p2309_p11 = pnand %p1738_p9, %p38_p12 }
  0x35   : > { %s220_s12 = sshll.u32 %s212_s11, 4  ;;  %s2313_s14 = scalar_lea.sflag [#allocation3], %s208_s29  ;;  %s2307_s12 = int_to_ptr.vmem [resolvable:$true] %s220_s12 }
  0x36   : > { %s2069_s15 = scalar_lea.hbm %s2305_s10, 8192  ;;  %p2071_p0 = pneg %p2309_p11 }
  0x37   : > { %p2070_p13 = scmp.ne.s32.totalorder %s2305_s10, %s2069_s15  ;;  %s2074_s27 = scalar_lea.hbm %s2659_s0, 16384 }
  0x38   : > { %p2075_p1 = scmp.lt.s32.totalorder %s2305_s10, %s2659_s0  ;;  %p2076_p2 = scmp.lt.s32.totalorder %s2074_s27, %s2069_s15 }
  0x39   : > { %p2072_p5 = pnand %p2071_p0, %p2070_p13 }
  0x3a   : > { %p2077_p6 = por %p2076_p2, %p2075_p1 }
  0x3b   : > { %p2073_p10 = pneg %p2072_p5 }
  0x3d   : > { %p2078_p12 = pnand %p2077_p6, %p2073_p10 }
  0x3f   : > { %2081 = shalt.err (!%p2078_p12)
}
  0x40   : > { %s2082_s29 = scalar_lea.vmem %s2307_s12, 8192  ;;  %s2173_s8 = smov [#allocation2]  }
  0x41   : > { %p2083_p3 = scmp.ne.s32.totalorder %s2307_s12, %s2082_s29  ;;  %s2087_s9 = sshll.u32 %s2173_s8, 4  ;;  %s2088_s9 = int_to_ptr.vmem [resolvable:$false] %s2087_s9 }
  0x42   : > { %s2089_s11 = scalar_lea.vmem %s2088_s9, 16384  ;;  %p2090_p5 = scmp.lt.s32.totalorder %s2307_s12, %s2088_s9 }
  0x43   : > { %p2085_p9 = pnand %p2083_p3, %p2071_p0  ;;  %p2091_p7 = scmp.lt.s32.totalorder %s2089_s11, %s2082_s29 }
  0x45   : > { %p2086_p13 = pneg %p2085_p9  ;;  %p2092_p4 = por %p2091_p7, %p2090_p5 }
  0x47   : > { %p2093_p8 = pnand %p2092_p4, %p2086_p13 }
  0x49   : > { %2096 = shalt.err (!%p2093_p8)
}
  0x4a   : > { %s2174_s15 = smov 256   ;;  %s2175_s16 = smov 16  }
  0x4b   : > { %1731 = dma.hbm_to_vmem [thread:$0]  (!%p2309_p11), %s2305_s10, 8192, %s2307_s12, %s2313_s14, %s2174_s15, %s2174_s15, %s2175_s16  }
  0x4c   : > { %p2676_p0 = scmp.ne.s32.totalorder %s2671_s26, 0 }
  0x4d   : > { %s2337_s23 = sand.u32 (!%p2676_p0), 1, %s2157_s19   ;;  %p2677_p4 = scmp.ne.s32.totalorder (!%p2676_p0), %s2669_s24, 0 }
  0x4e   : > { %232 = sbr.rel (%p2676_p0) target bundleno = 700 (0x2bc), region = 40  ;;  %s1550_s27 = sshll.u32 (!%p2676_p0), %s2337_s23, 9 }
  0x4f   : > { %s235_s7 = scalar_lea.sflag (!%p2676_p0), [#allocation3], %s2337_s23  ;;  %s2343_s6 = scalar_lea.vmem (!%p2676_p0), [#allocation2], %s1550_s27 }
  0x53   : > { %2140 = dma.done.wait (%p2677_p4), %s235_s7, 8192  }
  0x54   : > { %2142 = vsyncadd (%p2677_p4), %s235_s7, 4294959104  ;;  %p2678_p8 = scmp.eq.s32.totalorder %s2231_s22, 0 }
  0x56   : > { %2144 = dma.done.wait (%p2678_p8), [#allocation6], 4096   ;;  %p2679_p7 = pmov %p2678_p8 }
  0x57   : > { %v1785_v0 = vld [vmem:[#allocation5 + $0x78] sm:$0xff]   ;;  %v1787_v2 = vld [vmem:[#allocation5 + $0x70] sm:$0xff]   ;;  %v1789_v4 = vld [vmem:[#allocation5 + $0x68] sm:$0xff]   ;;  %s2490_s13 = scalar_lea.vmem [#allocation8], %s1550_s27  ;;  %s1596_s14 = sshll.u32 %s2231_s22, 13 }
  0x58   : > { %2146 = vsyncadd (%p2679_p7), [#allocation6], 4294963200  ;;  %v1786_v1 = vld [vmem:[#allocation5 + $0x38] sm:$0xff]   ;;  %1597 = vmatprep.subr.bf16.mxu0 %v1785_v0  ;;  %v1788_v3 = vld [vmem:[#allocation5 + $0x30] sm:$0xff]   ;;  %s1448_s29 = sshll.u32 %s2490_s13, 4  ;;  %s2612_s11 = scalar_lea.hbm %s2664_s5, %s1596_s14  ;;  %s2614_s29 = int_to_ptr.vmem [resolvable:$true] %s1448_s29 }
  0x59   : > { %1598 = vmatpush3.bf16.msra.mxu0 %v1786_v1  ;;  %v1790_v5 = vld [vmem:[#allocation5 + $0x28] sm:$0xff]   ;;  %v1791_v6 = vld [vmem:[#allocation5 + $0x60] sm:$0xff]   ;;  %v1793_v8 = vld [vmem:[#allocation5 + $0x58] sm:$0xff]   ;;  %s1434_s22 = scalar_lea.sflag [#allocation4], %s2337_s23  ;;  %s2097_s15 = scalar_lea.vmem %s2614_s29, 8192 }
  0x5a   : > { %1599 = vmatprep.subr.bf16.mxu0 %v1787_v2  ;;  %v1792_v7 = vld [vmem:[#allocation5 + $0x20] sm:$0xff]   ;;  %v1794_v9 = vld [vmem:[#allocation5 + $0x18] sm:$0xff]   ;;  %v1795_v10 = vld [vmem:[#allocation5 + $0x50] sm:$0xff]   ;;  %p2098_p11 = scmp.ne.s32.totalorder %s2614_s29, %s2097_s15  ;;  %p2680_p10 = scmp.ne.s32.totalorder %s2674_s30, 0 }
  0x5b   : > { %v277_v11 = vld [vmem:[%s2343_s6 + $0x8] sm:$0xff]  ;;  %v279_v12 = vld [vmem:[%s2343_s6 + $0x18] sm:$0xff]  ;;  %v1796_v14 = vld [vmem:[#allocation5 + $0x10] sm:$0xff]   ;;  %s2177_s16 = smov [#allocation8]  }
  0x5c   : > { %v341_v13 = vpack.c.bf16 %v279_v12, %v277_v11  ;;  %v1797_v15 = vld [vmem:[#allocation5 + $0x48] sm:$0xff]   ;;  %v1799_v17 = vld [vmem:[#allocation5 + $0x40] sm:$0xff]   ;;  %v278_v20 = vld [vmem:[%s2343_s6 + $0x10] sm:$0xff]  ;;  %p2099_p1 = pnand %p2098_p11, %p2680_p10  ;;  %s2101_s27 = sshll.u32 %s2177_s16, 4  ;;  %s2102_s27 = int_to_ptr.vmem [resolvable:$false] %s2101_s27 }
  0x5d   : > { %1600 = vmatpush3.bf16.msra.mxu0 %v1788_v3  ;;  %v1798_v16 = vld [vmem:[#allocation5 + $0x8] sm:$0xff]   ;;  %v1800_v18 = vld [vmem:[#allocation5] sm:$0xff]   ;;  %v283_v22 = vld [vmem:[%s2343_s6 + $0x38] sm:$0xff]  ;;  %s2103_s7 = scalar_lea.vmem %s2102_s27, 16384  ;;  %p2104_p6 = scmp.lt.s32.totalorder %s2614_s29, %s2102_s27 }
  0x5e   : > { %1601 = vmatprep.subr.bf16.mxu0 %v1789_v4  ;;  %539 = vmatprep.mubr.bf16.mxu0 %v341_v13  ;;  %v276_v19 = vld [vmem:[%s2343_s6] sm:$0xff]  ;;  %v281_v21 = vld [vmem:[%s2343_s6 + $0x28] sm:$0xff]  ;;  %v282_v26 = vld [vmem:[%s2343_s6 + $0x30] sm:$0xff]  ;;  %p2100_p2 = pneg %p2099_p1  ;;  %p2105_p12 = scmp.lt.s32.totalorder %s2103_s7, %s2097_s15 }
  0x5f   : > { %v340_v23 = vpack.c.bf16 %v278_v20, %v276_v19  ;;  %v343_v24 = vpack.c.bf16 %v283_v22, %v281_v21  ;;  %v280_v25 = vld [vmem:[%s2343_s6 + $0x20] sm:$0xff]  ;;  %v285_v27 = vld [vmem:[%s2343_s6 + $0x48] sm:$0xff]  ;;  %v287_v28 = vld [vmem:[%s2343_s6 + $0x58] sm:$0xff] }
  0x60   : > { %v342_v29 = vpack.c.bf16 %v282_v26, %v280_v25  ;;  %v345_v30 = vpack.c.bf16 %v287_v28, %v285_v27  ;;  %v284_v31 = vld [vmem:[%s2343_s6 + $0x40] sm:$0xff]  ;;  %v286_v32 = vld [vmem:[%s2343_s6 + $0x50] sm:$0xff]  ;;  %v289_v33 = vld [vmem:[%s2343_s6 + $0x68] sm:$0xff]  ;;  %p2106_p3 = por %p2105_p12, %p2104_p6 }
  0x61   : > { %1602 = vmatpush3.bf16.msra.mxu0 %v1790_v5  ;;  %v291_v34 = vld [vmem:[%s2343_s6 + $0x78] sm:$0xff]  ;;  %v344_v35 = vpack.c.bf16 %v286_v32, %v284_v31  ;;  %v288_v37 = vld [vmem:[%s2343_s6 + $0x60] sm:$0xff]  ;;  %v290_v38 = vld [vmem:[%s2343_s6 + $0x70] sm:$0xff] }
  0x62   : > { %1603 = vmatprep.subr.bf16.mxu0 %v1791_v6  ;;  %v347_v36 = vpack.c.bf16 %v291_v34, %v289_v33  ;;  %v293_v39 = vld [vmem:[%s2343_s6 + $0x88] sm:$0xff]  ;;  %v295_v40 = vld [vmem:[%s2343_s6 + $0x98] sm:$0xff]  ;;  %v346_v41 = vpack.c.bf16 %v290_v38, %v288_v37  ;;  %v292_v43 = vld [vmem:[%s2343_s6 + $0x80] sm:$0xff]  ;;  %p2107_p9 = pnand %p2106_p3, %p2100_p2 }
  0x63   : > { %v349_v42 = vpack.c.bf16 %v295_v40, %v293_v39  ;;  %v294_v44 = vld [vmem:[%s2343_s6 + $0x90] sm:$0xff]  ;;  %v297_v45 = vld [vmem:[%s2343_s6 + $0xa8] sm:$0xff]  ;;  %v299_v46 = vld [vmem:[%s2343_s6 + $0xb8] sm:$0xff] }
  0x64   : > { %v348_v47 = vpack.c.bf16 %v294_v44, %v292_v43  ;;  %v351_v48 = vpack.c.bf16 %v299_v46, %v297_v45  ;;  %v296_v49 = vld [vmem:[%s2343_s6 + $0xa0] sm:$0xff]  ;;  %v298_v50 = vld [vmem:[%s2343_s6 + $0xb0] sm:$0xff]  ;;  %v301_v51 = vld [vmem:[%s2343_s6 + $0xc8] sm:$0xff] }
  0x65   : > { %1604 = vmatpush3.bf16.msra.mxu0 %v1792_v7  ;;  %v303_v52 = vld [vmem:[%s2343_s6 + $0xd8] sm:$0xff]  ;;  %v350_v53 = vpack.c.bf16 %v298_v50, %v296_v49  ;;  %v300_v55 = vld [vmem:[%s2343_s6 + $0xc0] sm:$0xff]  ;;  %v302_v56 = vld [vmem:[%s2343_s6 + $0xd0] sm:$0xff]  ;;  %v2176_v49 = vmov 0  }
  0x66   : > { %1605 = vmatprep.subr.bf16.mxu0 %v1793_v8  ;;  %v353_v54 = vpack.c.bf16 %v303_v52, %v301_v51  ;;  %v305_v57 = vld [vmem:[%s2343_s6 + $0xe8] sm:$0xff]  ;;  %v307_v58 = vld [vmem:[%s2343_s6 + $0xf8] sm:$0xff]  ;;  %v352_v59 = vpack.c.bf16 %v302_v56, %v300_v55  ;;  %v304_v61 = vld [vmem:[%s2343_s6 + $0xe0] sm:$0xff]  ;;  %952 = vmatprep.mubr.bf16.mxu1 %v2176_v49 }
  0x67   : > { %v355_v60 = vpack.c.bf16 %v307_v58, %v305_v57  ;;  %v306_v62 = vld [vmem:[%s2343_s6 + $0xf0] sm:$0xff]  ;;  %v309_v63 = vld [vmem:[%s2343_s6 + $0x108] sm:$0xff]  ;;  %v311_v0 = vld [vmem:[%s2343_s6 + $0x118] sm:$0xff] }
  0x68   : > { %v354_v1 = vpack.c.bf16 %v306_v62, %v304_v61  ;;  %v357_v2 = vpack.c.bf16 %v311_v0, %v309_v63  ;;  %v308_v3 = vld [vmem:[%s2343_s6 + $0x100] sm:$0xff]  ;;  %v310_v4 = vld [vmem:[%s2343_s6 + $0x110] sm:$0xff]  ;;  %v313_v5 = vld [vmem:[%s2343_s6 + $0x128] sm:$0xff] }
  0x69   : > { %1606 = vmatpush3.bf16.msra.mxu0 %v1794_v9  ;;  %v315_v6 = vld [vmem:[%s2343_s6 + $0x138] sm:$0xff]  ;;  %v356_v7 = vpack.c.bf16 %v310_v4, %v308_v3  ;;  %v312_v11 = vld [vmem:[%s2343_s6 + $0x120] sm:$0xff]  ;;  %v314_v12 = vld [vmem:[%s2343_s6 + $0x130] sm:$0xff] }
  0x6a   : > { %1607 = vmatprep.subr.bf16.mxu0 %v1795_v10  ;;  %v359_v8 = vpack.c.bf16 %v315_v6, %v313_v5  ;;  %v1801_v9 = vld [vmem:[#allocation7 + $0x74] ss:$8 sps:$4 sm:$0xff]   ;;  %v1803_v10 = vld [vmem:[#allocation7 + $0x70] ss:$8 sps:$4 sm:$0xff]   ;;  %v317_v13 = vld [vmem:[%s2343_s6 + $0x148] sm:$0xff] }
  0x6b   : > { %920 = vmatprep.subr.bf16.mxu1 %v1801_v9  ;;  %v1807_v19 = vld [vmem:[#allocation7 + $0x54] ss:$8 sps:$4 sm:$0xff]   ;;  %v1809_v20 = vld [vmem:[#allocation7 + $0x50] ss:$8 sps:$4 sm:$0xff]   ;;  %v316_v21 = vld [vmem:[%s2343_s6 + $0x140] sm:$0xff] }
  0x6c   : > { %921 = vmatpush1.bf16.msra.mxu1 %v1803_v10  ;;  %v318_v22 = vld [vmem:[%s2343_s6 + $0x150] sm:$0xff]  ;;  %v1810_v25 = vld [vmem:[#allocation7 + $0x44] ss:$8 sps:$4 sm:$0xff]   ;;  %v1812_v27 = vld [vmem:[#allocation7 + $0x40] ss:$8 sps:$4 sm:$0xff]  }
  0x6d   : > { %1608 = vmatpush3.bf16.msra.mxu0 %v1796_v14  ;;  %v319_v14 = vld [vmem:[%s2343_s6 + $0x158] sm:$0xff]  ;;  %v360_v26 = vpack.c.bf16 %v318_v22, %v316_v21  ;;  %v320_v31 = vld [vmem:[%s2343_s6 + $0x160] sm:$0xff]  ;;  %v322_v32 = vld [vmem:[%s2343_s6 + $0x170] sm:$0xff] }
  0x6e   : > { %1609 = vmatprep.subr.bf16.mxu0 %v1797_v15  ;;  %v1804_v15 = vld [vmem:[#allocation7 + $0x64] ss:$8 sps:$4 sm:$0xff]   ;;  %v327_v34 = vld [vmem:[%s2343_s6 + $0x198] sm:$0xff]  ;;  %v1818_v37 = vld [vmem:[#allocation7 + $0x20] ss:$8 sps:$4 sm:$0xff]  }
  0x6f   : > { %922 = vmatprep.subr.bf16.mxu1 %v1804_v15  ;;  %v325_v33 = vld [vmem:[%s2343_s6 + $0x188] sm:$0xff]  ;;  %v1819_v39 = vld [vmem:[#allocation7 + $0x14] ss:$8 sps:$4 sm:$0xff]   ;;  %v1821_v40 = vld [vmem:[#allocation7 + $0x10] ss:$8 sps:$4 sm:$0xff]  }
  0x70   : > { %v365_v38 = vpack.c.bf16 %v327_v34, %v325_v33  ;;  %v329_v43 = vld [vmem:[%s2343_s6 + $0x1a8] sm:$0xff]  ;;  %v331_v44 = vld [vmem:[%s2343_s6 + $0x1b8] sm:$0xff]  ;;  %v328_v50 = vld [vmem:[%s2343_s6 + $0x1a0] sm:$0xff] }
  0x71   : > { %1610 = vmatpush3.bf16.msra.mxu0 %v1798_v16  ;;  %v358_v16 = vpack.c.bf16 %v314_v12, %v312_v11  ;;  %v1822_v45 = vld [vmem:[#allocation7 + $0x4] ss:$8 sps:$4 sm:$0xff]   ;;  %v330_v51 = vld [vmem:[%s2343_s6 + $0x1b0] sm:$0xff] }
  0x72   : > { %1611 = vmatprep.subr.bf16.mxu0 %v1799_v17  ;;  %v1806_v17 = vld [vmem:[#allocation7 + $0x60] ss:$8 sps:$4 sm:$0xff]   ;;  %v334_v57 = vld [vmem:[%s2343_s6 + $0x1d0] sm:$0xff] }
  0x73   : > { %923 = vmatpush1.bf16.msra.mxu1 %v1806_v17  ;;  %v333_v52 = vld [vmem:[%s2343_s6 + $0x1c8] sm:$0xff]  ;;  %v332_v56 = vld [vmem:[%s2343_s6 + $0x1c0] sm:$0xff]  ;;  %v338_v63 = vld [vmem:[%s2343_s6 + $0x1f0] sm:$0xff] }
  0x74   : > { %924 = vmatprep.subr.bf16.mxu1 %v1807_v19  ;;  %v337_v58 = vld [vmem:[%s2343_s6 + $0x1e8] sm:$0xff]  ;;  %v336_v62 = vld [vmem:[%s2343_s6 + $0x1e0] sm:$0xff] }
  0x75   : > { %1612 = vmatpush3.bf16.msra.mxu0 %v1800_v18  ;;  %v361_v18 = vpack.c.bf16 %v319_v14, %v317_v13  ;;  %v370_v0 = vpack.c.bf16 %v338_v63, %v336_v62 }
  0x77   : > { %925 = vmatpush1.bf16.msra.mxu1 %v1809_v20 }
  0x78   : > { %540 = vmatmul.mubr.bf16.vlgmr.msra.gmra.mxu0 %v340_v23  ;;  %v321_v23 = vld [vmem:[%s2343_s6 + $0x168] sm:$0xff]  ;;  %926 = vmatprep.subr.bf16.mxu1 %v1810_v25 }
  0x79   : > { %547 = vmatprep.mubr.bf16.mxu0 %v343_v24  ;;  %v323_v24 = vld [vmem:[%s2343_s6 + $0x178] sm:$0xff] }
  0x7a   : > { %v363_v28 = vpack.c.bf16 %v323_v24, %v321_v23 }
  0x7b   : > { %927 = vmatpush1.bf16.msra.mxu1 %v1812_v27 }
  0x80   : > { %548 = vmatmul.mubr.bf16.gmra.mxu0 %v342_v29  ;;  %v1813_v29 = vld [vmem:[#allocation7 + $0x34] ss:$8 sps:$4 sm:$0xff]  }
  0x81   : > { %555 = vmatprep.mubr.bf16.mxu0 %v345_v30  ;;  %v1815_v30 = vld [vmem:[#allocation7 + $0x30] ss:$8 sps:$4 sm:$0xff]   ;;  %928 = vmatprep.subr.bf16.mxu1 %v1813_v29 }
  0x82   : > { %929 = vmatpush1.bf16.msra.mxu1 %v1815_v30 }
  0x88   : > { %556 = vmatmul.mubr.bf16.gmra.mxu0 %v344_v35  ;;  %v1816_v35 = vld [vmem:[#allocation7 + $0x24] ss:$8 sps:$4 sm:$0xff]  }
  0x89   : > { %563 = vmatprep.mubr.bf16.mxu0 %v347_v36  ;;  %v362_v36 = vpack.c.bf16 %v322_v32, %v320_v31  ;;  %930 = vmatprep.subr.bf16.mxu1 %v1816_v35 }
  0x8a   : > { %931 = vmatpush1.bf16.msra.mxu1 %v1818_v37 }
  0x8b   : > { %932 = vmatprep.subr.bf16.mxu1 %v1819_v39 }
  0x8e   : > { %933 = vmatpush1.bf16.msra.mxu1 %v1821_v40 }
  0x8f   : > { %934 = vmatprep.subr.bf16.mxu1 %v1822_v45 }
  0x90   : > { %564 = vmatmul.mubr.bf16.gmra.mxu0 %v346_v41  ;;  %v324_v41 = vld [vmem:[%s2343_s6 + $0x180] sm:$0xff] }
  0x91   : > { %571 = vmatprep.mubr.bf16.mxu0 %v349_v42  ;;  %v326_v42 = vld [vmem:[%s2343_s6 + $0x190] sm:$0xff] }
  0x92   : > { %v364_v46 = vpack.c.bf16 %v326_v42, %v324_v41 }
  0x98   : > { %572 = vmatmul.mubr.bf16.gmra.mxu0 %v348_v47  ;;  %v1824_v47 = vld [vmem:[#allocation7] ss:$8 sps:$4 sm:$0xff]  }
  0x99   : > { %579 = vmatprep.mubr.bf16.mxu0 %v351_v48  ;;  %v367_v48 = vpack.c.bf16 %v331_v44, %v329_v43  ;;  %935 = vmatpush1.bf16.msra.mxu1 %v1824_v47 }
  0xa0   : > { %580 = vmatmul.mubr.bf16.gmra.mxu0 %v350_v53  ;;  %v335_v53 = vld [vmem:[%s2343_s6 + $0x1d8] sm:$0xff] }
  0xa1   : > { %587 = vmatprep.mubr.bf16.mxu0 %v353_v54  ;;  %v366_v54 = vpack.c.bf16 %v330_v51, %v328_v50  ;;  %v369_v55 = vpack.c.bf16 %v335_v53, %v333_v52 }
  0xa8   : > { %588 = vmatmul.mubr.bf16.gmra.mxu0 %v352_v59  ;;  %v339_v59 = vld [vmem:[%s2343_s6 + $0x1f8] sm:$0xff] }
  0xa9   : > { %595 = vmatprep.mubr.bf16.mxu0 %v355_v60  ;;  %v368_v60 = vpack.c.bf16 %v334_v57, %v332_v56  ;;  %v371_v61 = vpack.c.bf16 %v339_v59, %v337_v58 }
  0xb0   : > { %596 = vmatmul.mubr.bf16.gmra.mxu0 %v354_v1 }
  0xb1   : > { %603 = vmatprep.mubr.bf16.mxu0 %v357_v2  ;;  %v2421_v2 = vld [vmem:[%s2661_s2] ss:$0 sm:$0xff] }
  0xb8   : > { %604 = vmatmul.mubr.bf16.gmra.mxu0 %v356_v7 }
  0xb9   : > { %611 = vmatprep.mubr.bf16.mxu0 %v359_v8 }
  0xc0   : > { %612 = vmatmul.mubr.bf16.gmra.mxu0 %v358_v16 }
  0xc1   : > { %619 = vmatprep.mubr.bf16.mxu0 %v361_v18 }
  0xc8   : > { %620 = vmatmul.mubr.bf16.gmra.mxu0 %v360_v26 }
  0xc9   : > { %627 = vmatprep.mubr.bf16.mxu0 %v363_v28 }
  0xd0   : > { %628 = vmatmul.mubr.bf16.gmra.mxu0 %v362_v36 }
  0xd1   : > { %635 = vmatprep.mubr.bf16.mxu0 %v365_v38 }
  0xd8   : > { %636 = vmatmul.mubr.bf16.gmra.mxu0 %v364_v46 }
  0xd9   : > { %643 = vmatprep.mubr.bf16.mxu0 %v367_v48 }
  0xe0   : > { %644 = vmatmul.mubr.bf16.gmra.mxu0 %v366_v54 }
  0xe1   : > { %651 = vmatprep.mubr.bf16.mxu0 %v369_v55 }
  0xe8   : > { %652 = vmatmul.mubr.bf16.gmra.mxu0 %v368_v60 }
  0xe9   : > { %659 = vmatprep.mubr.bf16.mxu0 %v371_v61 }
  0xf0   : > { %660 = vmatmul.mubr.bf16.gmra.mxu0 %v370_v0 }
 0x138   : > { %v1613_v1 = vpop.f32.mrf.mxu0 }
 0x13a   : > { %v1614_v3 = vpop.f32.mrf.mxu0 }
 0x13b   : > { %v1615_v4 = vadd.f32 %v1614_v3, %v1613_v1 }
 0x13c   : > { %v1616_v5 = vpop.f32.mrf.mxu0 }
 0x13d   : > { %v542_v6 = vadd.f32 %v1615_v4, %v2421_v2 }
 0x13e   : > { %v1617_v7 = vpop.f32.mrf.mxu0 }
 0x13f   : > { %v668_v8 = vmul.f32 0.5, %v542_v6  ;;  %v1618_v9 = vadd.f32 %v1617_v7, %v1616_v5 }
 0x140   : > { %v1619_v10 = vpop.f32.mrf.mxu0 }
 0x141   : > { %1825 = vtanh.f32 %v668_v8  ;;  %v545_v11 = vadd.f32 %v1618_v9, %v2421_v2 }
 0x142   : > { %v1620_v12 = vpop.f32.mrf.mxu0 }
 0x143   : > { %v669_v13 = vmul.f32 0.5, %v545_v11  ;;  %v1621_v14 = vadd.f32 %v1620_v12, %v1619_v10 }
 0x144   : > { %v1622_v15 = vpop.f32.mrf.mxu0 }
 0x145   : > { %1827 = vtanh.f32 %v669_v13  ;;  %v550_v16 = vadd.f32 %v1621_v14, %v2421_v2 }
 0x146   : > { %v1623_v17 = vpop.f32.mrf.mxu0 }
 0x147   : > { %v670_v18 = vmul.f32 0.5, %v550_v16  ;;  %v1624_v19 = vadd.f32 %v1623_v17, %v1622_v15 }
 0x148   : > { %v1625_v20 = vpop.f32.mrf.mxu0 }
 0x149   : > { %1829 = vtanh.f32 %v670_v18  ;;  %v553_v21 = vadd.f32 %v1624_v19, %v2421_v2 }
 0x14a   : > { %v1626_v22 = vpop.f32.mrf.mxu0 }
 0x14b   : > { %v671_v23 = vmul.f32 0.5, %v553_v21  ;;  %v1627_v24 = vadd.f32 %v1626_v22, %v1625_v20 }
 0x14c   : > { %v1628_v25 = vpop.f32.mrf.mxu0 }
 0x14d   : > { %1831 = vtanh.f32 %v671_v23  ;;  %v558_v26 = vadd.f32 %v1627_v24, %v2421_v2 }
 0x14e   : > { %v1826_v27 = vpop.eup %1825  ;;  %v1629_v28 = vpop.f32.mrf.mxu0 }
 0x14f   : > { %v672_v29 = vmul.f32 0.5, %v558_v26  ;;  %v1630_v30 = vadd.f32 %v1629_v28, %v1628_v25  ;;  %v732_v33 = vmul.f32 0.5, %v1826_v27 }
 0x150   : > { %v1631_v31 = vpop.f32.mrf.mxu0 }
 0x151   : > { %1833 = vtanh.f32 %v672_v29  ;;  %v561_v32 = vadd.f32 %v1630_v30, %v2421_v2  ;;  %v764_v41 = vadd.f32 0.5, %v732_v33 }
 0x152   : > { %v1828_v34 = vpop.eup %1827  ;;  %v1632_v35 = vpop.f32.mrf.mxu0 }
 0x153   : > { %v673_v36 = vmul.f32 0.5, %v561_v32  ;;  %v1633_v37 = vadd.f32 %v1632_v35, %v1631_v31  ;;  %v733_v38 = vmul.f32 0.5, %v1828_v34 }
 0x154   : > { %v1634_v39 = vpop.f32.mrf.mxu0 }
 0x155   : > { %1835 = vtanh.f32 %v673_v36  ;;  %v566_v40 = vadd.f32 %v1633_v37, %v2421_v2  ;;  %v765_v42 = vadd.f32 0.5, %v733_v38 }
 0x156   : > { %v1830_v43 = vpop.eup %1829  ;;  %v1635_v44 = vpop.f32.mrf.mxu0 }
 0x157   : > { %v674_v45 = vmul.f32 0.5, %v566_v40  ;;  %v1636_v46 = vadd.f32 %v1635_v44, %v1634_v39  ;;  %v796_v47 = vpack.c.bf16 %v765_v42, %v764_v41  ;;  %v734_v51 = vmul.f32 0.5, %v1830_v43 }
 0x158   : > { %v1637_v48 = vpop.f32.mrf.mxu0 }
 0x159   : > { %1837 = vtanh.f32 %v674_v45  ;;  %v569_v50 = vadd.f32 %v1636_v46, %v2421_v2  ;;  %953 = vmatmul.mubr.bf16.vlgmr.msra.gmra.mxu1 %v796_v47  ;;  %v766_v59 = vadd.f32 0.5, %v734_v51 }
 0x15a   : > { %v1832_v52 = vpop.eup %1831  ;;  %v1638_v53 = vpop.f32.mrf.mxu0  ;;  %962 = vmatprep.mubr.bf16.mxu1 %v2176_v49 }
 0x15b   : > { %v675_v54 = vmul.f32 0.5, %v569_v50  ;;  %v1639_v55 = vadd.f32 %v1638_v53, %v1637_v48  ;;  %v735_v56 = vmul.f32 0.5, %v1832_v52 }
 0x15c   : > { %v1640_v57 = vpop.f32.mrf.mxu0 }
 0x15d   : > { %1839 = vtanh.f32 %v675_v54  ;;  %v574_v58 = vadd.f32 %v1639_v55, %v2421_v2  ;;  %v767_v60 = vadd.f32 0.5, %v735_v56 }
 0x15e   : > { %v1834_v61 = vpop.eup %1833  ;;  %v1641_v62 = vpop.f32.mrf.mxu0 }
 0x15f   : > { %v676_v63 = vmul.f32 0.5, %v574_v58  ;;  %v1642_v0 = vadd.f32 %v1641_v62, %v1640_v57  ;;  %v797_v1 = vpack.c.bf16 %v767_v60, %v766_v59  ;;  %v736_v5 = vmul.f32 0.5, %v1834_v61 }
 0x160   : > { %v1643_v3 = vpop.f32.mrf.mxu0 }
 0x161   : > { %1841 = vtanh.f32 %v676_v63  ;;  %v577_v4 = vadd.f32 %v1642_v0, %v2421_v2  ;;  %963 = vmatmul.mubr.bf16.gmra.mxu1 %v797_v1  ;;  %v768_v13 = vadd.f32 0.5, %v736_v5 }
 0x162   : > { %v1836_v6 = vpop.eup %1835  ;;  %v1644_v7 = vpop.f32.mrf.mxu0  ;;  %972 = vmatprep.mubr.bf16.mxu1 %v2176_v49 }
 0x163   : > { %v677_v8 = vmul.f32 0.5, %v577_v4  ;;  %v1645_v9 = vadd.f32 %v1644_v7, %v1643_v3  ;;  %v737_v10 = vmul.f32 0.5, %v1836_v6 }
 0x164   : > { %v1646_v11 = vpop.f32.mrf.mxu0 }
 0x165   : > { %1843 = vtanh.f32 %v677_v8  ;;  %v582_v12 = vadd.f32 %v1645_v9, %v2421_v2  ;;  %v769_v14 = vadd.f32 0.5, %v737_v10 }
 0x166   : > { %v1838_v15 = vpop.eup %1837  ;;  %v1647_v16 = vpop.f32.mrf.mxu0 }
 0x167   : > { %v678_v17 = vmul.f32 0.5, %v582_v12  ;;  %v1648_v18 = vadd.f32 %v1647_v16, %v1646_v11  ;;  %v798_v19 = vpack.c.bf16 %v769_v14, %v768_v13  ;;  %v738_v22 = vmul.f32 0.5, %v1838_v15 }
 0x168   : > { %v1649_v20 = vpop.f32.mrf.mxu0 }
 0x169   : > { %1845 = vtanh.f32 %v678_v17  ;;  %v585_v21 = vadd.f32 %v1648_v18, %v2421_v2  ;;  %973 = vmatmul.mubr.bf16.gmra.mxu1 %v798_v19  ;;  %v770_v30 = vadd.f32 0.5, %v738_v22 }
 0x16a   : > { %v1840_v23 = vpop.eup %1839  ;;  %v1650_v24 = vpop.f32.mrf.mxu0  ;;  %982 = vmatprep.mubr.bf16.mxu1 %v2176_v49 }
 0x16b   : > { %v679_v25 = vmul.f32 0.5, %v585_v21  ;;  %v1651_v26 = vadd.f32 %v1650_v24, %v1649_v20  ;;  %v739_v27 = vmul.f32 0.5, %v1840_v23 }
 0x16c   : > { %v1652_v28 = vpop.f32.mrf.mxu0 }
 0x16d   : > { %1847 = vtanh.f32 %v679_v25  ;;  %v590_v29 = vadd.f32 %v1651_v26, %v2421_v2  ;;  %v771_v31 = vadd.f32 0.5, %v739_v27 }
 0x16e   : > { %v1842_v32 = vpop.eup %1841  ;;  %v1653_v33 = vpop.f32.mrf.mxu0 }
 0x16f   : > { %v680_v34 = vmul.f32 0.5, %v590_v29  ;;  %v1654_v35 = vadd.f32 %v1653_v33, %v1652_v28  ;;  %v799_v36 = vpack.c.bf16 %v771_v31, %v770_v30  ;;  %v740_v39 = vmul.f32 0.5, %v1842_v32 }
 0x170   : > { %v1655_v37 = vpop.f32.mrf.mxu0 }
 0x171   : > { %1849 = vtanh.f32 %v680_v34  ;;  %v593_v38 = vadd.f32 %v1654_v35, %v2421_v2  ;;  %983 = vmatmul.mubr.bf16.gmra.mxu1 %v799_v36  ;;  %v772_v47 = vadd.f32 0.5, %v740_v39 }
 0x172   : > { %v1844_v40 = vpop.eup %1843  ;;  %v1656_v41 = vpop.f32.mrf.mxu0  ;;  %992 = vmatprep.mubr.bf16.mxu1 %v2176_v49 }
 0x173   : > { %v681_v42 = vmul.f32 0.5, %v593_v38  ;;  %v1657_v43 = vadd.f32 %v1656_v41, %v1655_v37  ;;  %v741_v44 = vmul.f32 0.5, %v1844_v40 }
 0x174   : > { %v1658_v45 = vpop.f32.mrf.mxu0 }
 0x175   : > { %1851 = vtanh.f32 %v681_v42  ;;  %v598_v46 = vadd.f32 %v1657_v43, %v2421_v2  ;;  %v773_v48 = vadd.f32 0.5, %v741_v44 }
 0x176   : > { %v1846_v50 = vpop.eup %1845  ;;  %v1659_v51 = vpop.f32.mrf.mxu0 }
 0x177   : > { %v682_v52 = vmul.f32 0.5, %v598_v46  ;;  %v1660_v53 = vadd.f32 %v1659_v51, %v1658_v45  ;;  %v800_v54 = vpack.c.bf16 %v773_v48, %v772_v47  ;;  %v742_v57 = vmul.f32 0.5, %v1846_v50 }
 0x178   : > { %v1661_v55 = vpop.f32.mrf.mxu0 }
 0x179   : > { %1853 = vtanh.f32 %v682_v52  ;;  %v601_v56 = vadd.f32 %v1660_v53, %v2421_v2  ;;  %993 = vmatmul.mubr.bf16.gmra.mxu1 %v800_v54  ;;  %v774_v1 = vadd.f32 0.5, %v742_v57 }
 0x17a   : > { %v1848_v58 = vpop.eup %1847  ;;  %v1662_v59 = vpop.f32.mrf.mxu0  ;;  %1002 = vmatprep.mubr.bf16.mxu1 %v2176_v49 }
 0x17b   : > { %v683_v60 = vmul.f32 0.5, %v601_v56  ;;  %v1663_v61 = vadd.f32 %v1662_v59, %v1661_v55  ;;  %v743_v62 = vmul.f32 0.5, %v1848_v58 }
 0x17c   : > { %v1664_v63 = vpop.f32.mrf.mxu0 }
 0x17d   : > { %1855 = vtanh.f32 %v683_v60  ;;  %v606_v0 = vadd.f32 %v1663_v61, %v2421_v2  ;;  %v775_v3 = vadd.f32 0.5, %v743_v62 }
 0x17e   : > { %v1850_v4 = vpop.eup %1849  ;;  %v1665_v5 = vpop.f32.mrf.mxu0 }
 0x17f   : > { %v684_v6 = vmul.f32 0.5, %v606_v0  ;;  %v1666_v7 = vadd.f32 %v1665_v5, %v1664_v63  ;;  %v801_v8 = vpack.c.bf16 %v775_v3, %v774_v1  ;;  %v744_v11 = vmul.f32 0.5, %v1850_v4 }
 0x180   : > { %v1667_v9 = vpop.f32.mrf.mxu0 }
 0x181   : > { %1857 = vtanh.f32 %v684_v6  ;;  %v609_v10 = vadd.f32 %v1666_v7, %v2421_v2  ;;  %1003 = vmatmul.mubr.bf16.gmra.mxu1 %v801_v8  ;;  %v776_v19 = vadd.f32 0.5, %v744_v11 }
 0x182   : > { %v1852_v12 = vpop.eup %1851  ;;  %v1668_v13 = vpop.f32.mrf.mxu0  ;;  %1012 = vmatprep.mubr.bf16.mxu1 %v2176_v49 }
 0x183   : > { %v685_v14 = vmul.f32 0.5, %v609_v10  ;;  %v1669_v15 = vadd.f32 %v1668_v13, %v1667_v9  ;;  %v745_v16 = vmul.f32 0.5, %v1852_v12 }
 0x184   : > { %v1670_v17 = vpop.f32.mrf.mxu0 }
 0x185   : > { %1859 = vtanh.f32 %v685_v14  ;;  %v614_v18 = vadd.f32 %v1669_v15, %v2421_v2  ;;  %v777_v20 = vadd.f32 0.5, %v745_v16 }
 0x186   : > { %v1854_v21 = vpop.eup %1853  ;;  %v1671_v22 = vpop.f32.mrf.mxu0 }
 0x187   : > { %v686_v23 = vmul.f32 0.5, %v614_v18  ;;  %v1672_v24 = vadd.f32 %v1671_v22, %v1670_v17  ;;  %v802_v25 = vpack.c.bf16 %v777_v20, %v776_v19  ;;  %v746_v28 = vmul.f32 0.5, %v1854_v21 }
 0x188   : > { %v1673_v26 = vpop.f32.mrf.mxu0 }
 0x189   : > { %1861 = vtanh.f32 %v686_v23  ;;  %v617_v27 = vadd.f32 %v1672_v24, %v2421_v2  ;;  %1013 = vmatmul.mubr.bf16.gmra.mxu1 %v802_v25  ;;  %v778_v36 = vadd.f32 0.5, %v746_v28 }
 0x18a   : > { %v1856_v29 = vpop.eup %1855  ;;  %v1674_v30 = vpop.f32.mrf.mxu0  ;;  %1022 = vmatprep.mubr.bf16.mxu1 %v2176_v49 }
 0x18b   : > { %v687_v31 = vmul.f32 0.5, %v617_v27  ;;  %v1675_v32 = vadd.f32 %v1674_v30, %v1673_v26  ;;  %v747_v33 = vmul.f32 0.5, %v1856_v29 }
 0x18c   : > { %v1676_v34 = vpop.f32.mrf.mxu0 }
 0x18d   : > { %1863 = vtanh.f32 %v687_v31  ;;  %v622_v35 = vadd.f32 %v1675_v32, %v2421_v2  ;;  %v779_v37 = vadd.f32 0.5, %v747_v33 }
 0x18e   : > { %v1858_v38 = vpop.eup %1857  ;;  %v1677_v39 = vpop.f32.mrf.mxu0 }
 0x18f   : > { %v688_v40 = vmul.f32 0.5, %v622_v35  ;;  %v1678_v41 = vadd.f32 %v1677_v39, %v1676_v34  ;;  %v803_v42 = vpack.c.bf16 %v779_v37, %v778_v36  ;;  %v748_v45 = vmul.f32 0.5, %v1858_v38 }
 0x190   : > { %v1679_v43 = vpop.f32.mrf.mxu0 }
 0x191   : > { %1865 = vtanh.f32 %v688_v40  ;;  %v625_v44 = vadd.f32 %v1678_v41, %v2421_v2  ;;  %1023 = vmatmul.mubr.bf16.gmra.mxu1 %v803_v42  ;;  %v780_v54 = vadd.f32 0.5, %v748_v45 }
 0x192   : > { %v1860_v46 = vpop.eup %1859  ;;  %v1680_v47 = vpop.f32.mrf.mxu0  ;;  %1032 = vmatprep.mubr.bf16.mxu1 %v2176_v49 }
 0x193   : > { %v689_v48 = vmul.f32 0.5, %v625_v44  ;;  %v1681_v50 = vadd.f32 %v1680_v47, %v1679_v43  ;;  %v749_v51 = vmul.f32 0.5, %v1860_v46 }
 0x194   : > { %v1682_v52 = vpop.f32.mrf.mxu0 }
 0x195   : > { %1867 = vtanh.f32 %v689_v48  ;;  %v630_v53 = vadd.f32 %v1681_v50, %v2421_v2  ;;  %v781_v55 = vadd.f32 0.5, %v749_v51 }
 0x196   : > { %v1862_v56 = vpop.eup %1861  ;;  %v1683_v57 = vpop.f32.mrf.mxu0 }
 0x197   : > { %v690_v58 = vmul.f32 0.5, %v630_v53  ;;  %v1684_v59 = vadd.f32 %v1683_v57, %v1682_v52  ;;  %v804_v60 = vpack.c.bf16 %v781_v55, %v780_v54  ;;  %v750_v63 = vmul.f32 0.5, %v1862_v56 }
 0x198   : > { %v1685_v61 = vpop.f32.mrf.mxu0 }
 0x199   : > { %1869 = vtanh.f32 %v690_v58  ;;  %v633_v62 = vadd.f32 %v1684_v59, %v2421_v2  ;;  %1033 = vmatmul.mubr.bf16.gmra.mxu1 %v804_v60  ;;  %v782_v8 = vadd.f32 0.5, %v750_v63 }
 0x19a   : > { %v1864_v0 = vpop.eup %1863  ;;  %v1686_v1 = vpop.f32.mrf.mxu0  ;;  %1042 = vmatprep.mubr.bf16.mxu1 %v2176_v49 }
 0x19b   : > { %v691_v3 = vmul.f32 0.5, %v633_v62  ;;  %v1687_v4 = vadd.f32 %v1686_v1, %v1685_v61  ;;  %v751_v5 = vmul.f32 0.5, %v1864_v0 }
 0x19c   : > { %v1688_v6 = vpop.f32.mrf.mxu0 }
 0x19d   : > { %1871 = vtanh.f32 %v691_v3  ;;  %v638_v7 = vadd.f32 %v1687_v4, %v2421_v2  ;;  %v783_v9 = vadd.f32 0.5, %v751_v5 }
 0x19e   : > { %v1866_v10 = vpop.eup %1865  ;;  %v1689_v11 = vpop.f32.mrf.mxu0 }
 0x19f   : > { %v692_v12 = vmul.f32 0.5, %v638_v7  ;;  %v1690_v13 = vadd.f32 %v1689_v11, %v1688_v6  ;;  %v805_v14 = vpack.c.bf16 %v783_v9, %v782_v8  ;;  %v752_v17 = vmul.f32 0.5, %v1866_v10 }
 0x1a0   : > { %v1691_v15 = vpop.f32.mrf.mxu0 }
 0x1a1   : > { %1873 = vtanh.f32 %v692_v12  ;;  %v641_v16 = vadd.f32 %v1690_v13, %v2421_v2  ;;  %1043 = vmatmul.mubr.bf16.gmra.mxu1 %v805_v14  ;;  %v784_v25 = vadd.f32 0.5, %v752_v17 }
 0x1a2   : > { %v1868_v18 = vpop.eup %1867  ;;  %v1692_v19 = vpop.f32.mrf.mxu0  ;;  %1052 = vmatprep.mubr.bf16.mxu1 %v2176_v49 }
 0x1a3   : > { %v693_v20 = vmul.f32 0.5, %v641_v16  ;;  %v1693_v21 = vadd.f32 %v1692_v19, %v1691_v15  ;;  %v753_v22 = vmul.f32 0.5, %v1868_v18 }
 0x1a4   : > { %v1694_v23 = vpop.f32.mrf.mxu0 }
 0x1a5   : > { %1875 = vtanh.f32 %v693_v20  ;;  %v646_v24 = vadd.f32 %v1693_v21, %v2421_v2  ;;  %v785_v26 = vadd.f32 0.5, %v753_v22 }
 0x1a6   : > { %v1870_v27 = vpop.eup %1869  ;;  %v1695_v28 = vpop.f32.mrf.mxu0 }
 0x1a7   : > { %v694_v29 = vmul.f32 0.5, %v646_v24  ;;  %v1696_v30 = vadd.f32 %v1695_v28, %v1694_v23  ;;  %v806_v31 = vpack.c.bf16 %v785_v26, %v784_v25  ;;  %v754_v34 = vmul.f32 0.5, %v1870_v27  ;;  %v828_v28 = vld [vmem:[%s2663_s4] sm:$0x3] }
 0x1a8   : > { %v1697_v32 = vpop.f32.mrf.mxu0  ;;  %v830_v25 = vlaneseq }
 0x1a9   : > { %1877 = vtanh.f32 %v694_v29  ;;  %v649_v33 = vadd.f32 %v1696_v30, %v2421_v2  ;;  %1053 = vmatmul.mubr.bf16.gmra.mxu1 %v806_v31  ;;  %v786_v42 = vadd.f32 0.5, %v754_v34 }
 0x1aa   : > { %v1872_v35 = vpop.eup %1871  ;;  %v1698_v36 = vpop.f32.mrf.mxu0  ;;  %1062 = vmatprep.mubr.bf16.mxu1 %v2176_v49  ;;  %v831_v26 = vshrl.u32 %v830_v25, 7 }
 0x1ab   : > { %v695_v37 = vmul.f32 0.5, %v649_v33  ;;  %v1699_v38 = vadd.f32 %v1698_v36, %v1697_v32  ;;  %v755_v39 = vmul.f32 0.5, %v1872_v35 }
 0x1ac   : > { %v1700_v40 = vpop.f32.mrf.mxu0  ;;  %v832_v27 = vsub.s32 0, %v831_v26  ;;  %v836_v29 = vsub.s32 1, %v831_v26 }
 0x1ad   : > { %1879 = vtanh.f32 %v695_v37  ;;  %v654_v41 = vadd.f32 %v1699_v38, %v2421_v2  ;;  %v787_v43 = vadd.f32 0.5, %v755_v39 }
 0x1ae   : > { %v1874_v44 = vpop.eup %1873  ;;  %v1701_v45 = vpop.f32.mrf.mxu0  ;;  %v2473_v30 = vrot.slane %v828_v28, %v832_v27  ;;  %v2475_v31 = vrot.slane %v828_v28, %v836_v29 }
 0x1af   : > { %v696_v46 = vmul.f32 0.5, %v654_v41  ;;  %v1702_v47 = vadd.f32 %v1701_v45, %v1700_v40  ;;  %v807_v48 = vpack.c.bf16 %v787_v43, %v786_v42  ;;  %v756_v52 = vmul.f32 0.5, %v1874_v44 }
 0x1b0   : > { %v1703_v50 = vpop.f32.mrf.mxu0 }
 0x1b1   : > { %1881 = vtanh.f32 %v696_v46  ;;  %v657_v51 = vadd.f32 %v1702_v47, %v2421_v2  ;;  %1063 = vmatmul.mubr.bf16.gmra.mxu1 %v807_v48  ;;  %v788_v60 = vadd.f32 0.5, %v756_v52 }
 0x1b2   : > { %v1876_v53 = vpop.eup %1875  ;;  %v1704_v54 = vpop.f32.mrf.mxu0  ;;  %1072 = vmatprep.mubr.bf16.mxu1 %v2176_v49 }
 0x1b3   : > { %v697_v55 = vmul.f32 0.5, %v657_v51  ;;  %v1705_v56 = vadd.f32 %v1704_v54, %v1703_v50  ;;  %v757_v57 = vmul.f32 0.5, %v1876_v53 }
 0x1b4   : > { %v1706_v58 = vpop.f32.mrf.mxu0 }
 0x1b5   : > { %1883 = vtanh.f32 %v697_v55  ;;  %v662_v59 = vadd.f32 %v1705_v56, %v2421_v2  ;;  %v789_v61 = vadd.f32 0.5, %v757_v57 }
 0x1b6   : > { %v1878_v62 = vpop.eup %1877  ;;  %v1707_v63 = vpop.f32.mrf.mxu0 }
 0x1b7   : > { %v698_v0 = vmul.f32 0.5, %v662_v59  ;;  %v1708_v1 = vadd.f32 %v1707_v63, %v1706_v58  ;;  %v808_v3 = vpack.c.bf16 %v789_v61, %v788_v60  ;;  %v758_v5 = vmul.f32 0.5, %v1878_v62 }
 0x1b9   : > { %1885 = vtanh.f32 %v698_v0  ;;  %v665_v4 = vadd.f32 %v1708_v1, %v2421_v2  ;;  %1073 = vmatmul.mubr.bf16.gmra.mxu1 %v808_v3  ;;  %v790_v9 = vadd.f32 0.5, %v758_v5 }
 0x1ba   : > { %v1880_v6 = vpop.eup %1879  ;;  %1082 = vmatprep.mubr.bf16.mxu1 %v2176_v49 }
 0x1bb   : > { %v699_v7 = vmul.f32 0.5, %v665_v4  ;;  %v759_v8 = vmul.f32 0.5, %v1880_v6 }
 0x1bd   : > { %1887 = vtanh.f32 %v699_v7  ;;  %v791_v10 = vadd.f32 0.5, %v759_v8 }
 0x1be   : > { %v1882_v11 = vpop.eup %1881 }
 0x1bf   : > { %v809_v12 = vpack.c.bf16 %v791_v10, %v790_v9  ;;  %v760_v13 = vmul.f32 0.5, %v1882_v11 }
 0x1c1   : > { %1083 = vmatmul.mubr.bf16.gmra.mxu1 %v809_v12  ;;  %v792_v16 = vadd.f32 0.5, %v760_v13 }
 0x1c2   : > { %v1884_v14 = vpop.eup %1883  ;;  %1092 = vmatprep.mubr.bf16.mxu1 %v2176_v49 }
 0x1c3   : > { %v761_v15 = vmul.f32 0.5, %v1884_v14 }
 0x1c5   : > { %v793_v2 = vadd.f32 0.5, %v761_v15 }
 0x1c6   : > { %v1886_v17 = vpop.eup %1885 }
 0x1c7   : > { %v810_v18 = vpack.c.bf16 %v793_v2, %v792_v16  ;;  %v762_v19 = vmul.f32 0.5, %v1886_v17 }
 0x1c9   : > { %1093 = vmatmul.mubr.bf16.gmra.mxu1 %v810_v18  ;;  %v794_v22 = vadd.f32 0.5, %v762_v19 }
 0x1ca   : > { %v1888_v20 = vpop.eup %1887  ;;  %1102 = vmatprep.mubr.bf16.mxu1 %v2176_v49 }
 0x1cb   : > { %v763_v21 = vmul.f32 0.5, %v1888_v20 }
 0x1cd   : > { %v795_v23 = vadd.f32 0.5, %v763_v21 }
 0x1cf   : > { %v811_v24 = vpack.c.bf16 %v795_v23, %v794_v22 }
 0x1d1   : > { %1103 = vmatmul.mubr.bf16.gmra.mxu1 %v811_v24 }
 0x219   : > { %v954_v32 = vpop.f32.mrf.mxu1 }
 0x21a   : > { %v955_v49 = vadd.f32 %v954_v32, %v2473_v30 }
 0x21b   : > { %v956_v33 = vpop.f32.mrf.mxu1 }
 0x21c   : > { %v1113_v34 = vmul.f32 0.5, %v955_v49  ;;  %v957_v35 = vadd.f32 %v956_v33, %v2475_v31 }
 0x21d   : > { %v958_v36 = vpop.f32.mrf.mxu1 }
 0x21e   : > { %1889 = vtanh.f32 %v1113_v34  ;;  %v1114_v37 = vmul.f32 0.5, %v957_v35  ;;  %v959_v38 = vadd.f32 %v958_v36, %v2473_v30 }
 0x21f   : > { %v960_v39 = vpop.f32.mrf.mxu1 }
 0x220   : > { %1891 = vtanh.f32 %v1114_v37  ;;  %v1115_v40 = vmul.f32 0.5, %v959_v38  ;;  %v961_v41 = vadd.f32 %v960_v39, %v2475_v31 }
 0x221   : > { %v964_v42 = vpop.f32.mrf.mxu1 }
 0x222   : > { %1893 = vtanh.f32 %v1115_v40  ;;  %v1116_v43 = vmul.f32 0.5, %v961_v41  ;;  %v965_v44 = vadd.f32 %v964_v42, %v2473_v30 }
 0x223   : > { %v966_v45 = vpop.f32.mrf.mxu1 }
 0x224   : > { %1895 = vtanh.f32 %v1116_v43  ;;  %v1117_v46 = vmul.f32 0.5, %v965_v44  ;;  %v967_v47 = vadd.f32 %v966_v45, %v2475_v31 }
 0x225   : > { %v968_v48 = vpop.f32.mrf.mxu1 }
 0x226   : > { %1897 = vtanh.f32 %v1117_v46  ;;  %v1118_v50 = vmul.f32 0.5, %v967_v47  ;;  %v969_v51 = vadd.f32 %v968_v48, %v2473_v30 }
 0x227   : > { %v970_v52 = vpop.f32.mrf.mxu1 }
 0x228   : > { %1899 = vtanh.f32 %v1118_v50  ;;  %v1119_v53 = vmul.f32 0.5, %v969_v51  ;;  %v971_v54 = vadd.f32 %v970_v52, %v2475_v31 }
 0x229   : > { %v974_v55 = vpop.f32.mrf.mxu1 }
 0x22a   : > { %1901 = vtanh.f32 %v1119_v53  ;;  %v1120_v56 = vmul.f32 0.5, %v971_v54  ;;  %v975_v57 = vadd.f32 %v974_v55, %v2473_v30 }
 0x22b   : > { %v1890_v58 = vpop.eup %1889  ;;  %v976_v59 = vpop.f32.mrf.mxu1 }
 0x22c   : > { %v1241_v60 = vmul.f32 0.5, %v1890_v58  ;;  %1903 = vtanh.f32 %v1120_v56  ;;  %v1121_v61 = vmul.f32 0.5, %v975_v57  ;;  %v977_v62 = vadd.f32 %v976_v59, %v2475_v31 }
 0x22d   : > { %v1892_v63 = vpop.eup %1891  ;;  %v978_v0 = vpop.f32.mrf.mxu1 }
 0x22e   : > { %v1305_v1 = vadd.f32 0.5, %v1241_v60  ;;  %v1242_v3 = vmul.f32 0.5, %v1892_v63  ;;  %1905 = vtanh.f32 %v1121_v61  ;;  %v1122_v4 = vmul.f32 0.5, %v977_v62 }
 0x22f   : > { %v1894_v5 = vpop.eup %1893  ;;  %v979_v6 = vadd.f32 %v978_v0, %v2473_v30  ;;  %v980_v7 = vpop.f32.mrf.mxu1 }
 0x230   : > { %1369 = vst [vmem:[%s2490_s13] sm:$0xff] %v1305_v1  ;;  %v1306_v8 = vadd.f32 0.5, %v1242_v3  ;;  %v1243_v9 = vmul.f32 0.5, %v1894_v5  ;;  %1907 = vtanh.f32 %v1122_v4  ;;  %v981_v10 = vadd.f32 %v980_v7, %v2475_v31 }
 0x231   : > { %v1896_v11 = vpop.eup %1895  ;;  %v1123_v12 = vmul.f32 0.5, %v979_v6  ;;  %v984_v13 = vpop.f32.mrf.mxu1 }
 0x232   : > { %1370 = vst [vmem:[%s2490_s13 + $0x8] sm:$0xff] %v1306_v8  ;;  %v1307_v14 = vadd.f32 0.5, %v1243_v9  ;;  %v1244_v15 = vmul.f32 0.5, %v1896_v11  ;;  %v1124_v16 = vmul.f32 0.5, %v981_v10  ;;  %v985_v2 = vadd.f32 %v984_v13, %v2473_v30 }
 0x233   : > { %v1898_v17 = vpop.eup %1897  ;;  %1909 = vtanh.f32 %v1123_v12  ;;  %v986_v18 = vpop.f32.mrf.mxu1 }
 0x234   : > { %1371 = vst [vmem:[%s2490_s13 + $0x10] sm:$0xff] %v1307_v14  ;;  %v1308_v19 = vadd.f32 0.5, %v1244_v15  ;;  %v1245_v20 = vmul.f32 0.5, %v1898_v17  ;;  %1911 = vtanh.f32 %v1124_v16  ;;  %v1125_v21 = vmul.f32 0.5, %v985_v2 }
 0x235   : > { %v1900_v22 = vpop.eup %1899  ;;  %v987_v23 = vadd.f32 %v986_v18, %v2475_v31  ;;  %v988_v24 = vpop.f32.mrf.mxu1 }
 0x236   : > { %1372 = vst [vmem:[%s2490_s13 + $0x18] sm:$0xff] %v1308_v19  ;;  %v1309_v25 = vadd.f32 0.5, %v1245_v20  ;;  %v1246_v26 = vmul.f32 0.5, %v1900_v22  ;;  %1913 = vtanh.f32 %v1125_v21  ;;  %v989_v27 = vadd.f32 %v988_v24, %v2473_v30 }
 0x237   : > { %v1902_v28 = vpop.eup %1901  ;;  %v1126_v29 = vmul.f32 0.5, %v987_v23  ;;  %v990_v32 = vpop.f32.mrf.mxu1 }
 0x238   : > { %1373 = vst [vmem:[%s2490_s13 + $0x20] sm:$0xff] %v1309_v25  ;;  %v1310_v49 = vadd.f32 0.5, %v1246_v26  ;;  %v1247_v33 = vmul.f32 0.5, %v1902_v28  ;;  %v1127_v34 = vmul.f32 0.5, %v989_v27  ;;  %v991_v35 = vadd.f32 %v990_v32, %v2475_v31 }
 0x239   : > { %v1904_v36 = vpop.eup %1903  ;;  %1915 = vtanh.f32 %v1126_v29  ;;  %v994_v37 = vpop.f32.mrf.mxu1 }
 0x23a   : > { %1374 = vst [vmem:[%s2490_s13 + $0x28] sm:$0xff] %v1310_v49  ;;  %v1311_v38 = vadd.f32 0.5, %v1247_v33  ;;  %v1248_v39 = vmul.f32 0.5, %v1904_v36  ;;  %1917 = vtanh.f32 %v1127_v34  ;;  %v1128_v40 = vmul.f32 0.5, %v991_v35 }
 0x23b   : > { %v1906_v41 = vpop.eup %1905  ;;  %v995_v42 = vadd.f32 %v994_v37, %v2473_v30  ;;  %v996_v43 = vpop.f32.mrf.mxu1 }
 0x23c   : > { %1375 = vst [vmem:[%s2490_s13 + $0x30] sm:$0xff] %v1311_v38  ;;  %v1312_v44 = vadd.f32 0.5, %v1248_v39  ;;  %v1249_v45 = vmul.f32 0.5, %v1906_v41  ;;  %1919 = vtanh.f32 %v1128_v40  ;;  %v997_v46 = vadd.f32 %v996_v43, %v2475_v31 }
 0x23d   : > { %v1908_v47 = vpop.eup %1907  ;;  %v1129_v48 = vmul.f32 0.5, %v995_v42  ;;  %v998_v50 = vpop.f32.mrf.mxu1 }
 0x23e   : > { %1376 = vst [vmem:[%s2490_s13 + $0x38] sm:$0xff] %v1312_v44  ;;  %v1313_v51 = vadd.f32 0.5, %v1249_v45  ;;  %v1250_v52 = vmul.f32 0.5, %v1908_v47  ;;  %v1130_v53 = vmul.f32 0.5, %v997_v46  ;;  %v999_v54 = vadd.f32 %v998_v50, %v2473_v30 }
 0x23f   : > { %1921 = vtanh.f32 %v1129_v48  ;;  %v1000_v55 = vpop.f32.mrf.mxu1 }
 0x240   : > { %v1910_v56 = vpop.eup %1909  ;;  %1377 = vst [vmem:[%s2490_s13 + $0x40] sm:$0xff] %v1313_v51  ;;  %v1314_v57 = vadd.f32 0.5, %v1250_v52  ;;  %1923 = vtanh.f32 %v1130_v53  ;;  %v1131_v58 = vmul.f32 0.5, %v999_v54  ;;  %v1001_v59 = vadd.f32 %v1000_v55, %v2475_v31 }
 0x241   : > { %v1912_v60 = vpop.eup %1911  ;;  %v1251_v61 = vmul.f32 0.5, %v1910_v56  ;;  %v1004_v62 = vpop.f32.mrf.mxu1 }
 0x242   : > { %1378 = vst [vmem:[%s2490_s13 + $0x48] sm:$0xff] %v1314_v57  ;;  %v1252_v63 = vmul.f32 0.5, %v1912_v60  ;;  %1925 = vtanh.f32 %v1131_v58  ;;  %v1132_v0 = vmul.f32 0.5, %v1001_v59  ;;  %v1005_v1 = vadd.f32 %v1004_v62, %v2473_v30 }
 0x243   : > { %v1914_v3 = vpop.eup %1913  ;;  %v1315_v4 = vadd.f32 0.5, %v1251_v61  ;;  %v1006_v5 = vpop.f32.mrf.mxu1 }
 0x244   : > { %v1316_v6 = vadd.f32 0.5, %v1252_v63  ;;  %v1253_v7 = vmul.f32 0.5, %v1914_v3  ;;  %1927 = vtanh.f32 %v1132_v0  ;;  %v1133_v8 = vmul.f32 0.5, %v1005_v1 }
 0x245   : > { %1379 = vst [vmem:[%s2490_s13 + $0x50] sm:$0xff] %v1315_v4  ;;  %v1007_v9 = vadd.f32 %v1006_v5, %v2475_v31  ;;  %v1008_v10 = vpop.f32.mrf.mxu1 }
 0x246   : > { %v1916_v11 = vpop.eup %1915  ;;  %1380 = vst [vmem:[%s2490_s13 + $0x58] sm:$0xff] %v1316_v6  ;;  %v1317_v12 = vadd.f32 0.5, %v1253_v7  ;;  %1929 = vtanh.f32 %v1133_v8  ;;  %v1009_v13 = vadd.f32 %v1008_v10, %v2473_v30 }
 0x247   : > { %v1918_v14 = vpop.eup %1917  ;;  %v1254_v15 = vmul.f32 0.5, %v1916_v11  ;;  %v1134_v16 = vmul.f32 0.5, %v1007_v9  ;;  %v1010_v2 = vpop.f32.mrf.mxu1 }
 0x248   : > { %1381 = vst [vmem:[%s2490_s13 + $0x60] sm:$0xff] %v1317_v12  ;;  %v1255_v17 = vmul.f32 0.5, %v1918_v14  ;;  %v1135_v18 = vmul.f32 0.5, %v1009_v13  ;;  %v1011_v19 = vadd.f32 %v1010_v2, %v2475_v31 }
 0x249   : > { %v1920_v20 = vpop.eup %1919  ;;  %v1318_v21 = vadd.f32 0.5, %v1254_v15  ;;  %1931 = vtanh.f32 %v1134_v16  ;;  %v1014_v22 = vpop.f32.mrf.mxu1 }
 0x24a   : > { %v1319_v23 = vadd.f32 0.5, %v1255_v17  ;;  %v1256_v24 = vmul.f32 0.5, %v1920_v20  ;;  %1933 = vtanh.f32 %v1135_v18  ;;  %v1136_v25 = vmul.f32 0.5, %v1011_v19 }
 0x24b   : > { %1382 = vst [vmem:[%s2490_s13 + $0x68] sm:$0xff] %v1318_v21  ;;  %v1015_v26 = vadd.f32 %v1014_v22, %v2473_v30  ;;  %v1016_v27 = vpop.f32.mrf.mxu1 }
 0x24c   : > { %v1922_v28 = vpop.eup %1921  ;;  %1383 = vst [vmem:[%s2490_s13 + $0x70] sm:$0xff] %v1319_v23  ;;  %v1320_v29 = vadd.f32 0.5, %v1256_v24  ;;  %1935 = vtanh.f32 %v1136_v25  ;;  %v1017_v32 = vadd.f32 %v1016_v27, %v2475_v31 }
 0x24d   : > { %v1924_v49 = vpop.eup %1923  ;;  %v1257_v33 = vmul.f32 0.5, %v1922_v28  ;;  %v1137_v34 = vmul.f32 0.5, %v1015_v26  ;;  %v1018_v35 = vpop.f32.mrf.mxu1 }
 0x24e   : > { %1384 = vst [vmem:[%s2490_s13 + $0x78] sm:$0xff] %v1320_v29  ;;  %v1258_v36 = vmul.f32 0.5, %v1924_v49  ;;  %v1138_v37 = vmul.f32 0.5, %v1017_v32  ;;  %v1019_v38 = vadd.f32 %v1018_v35, %v2473_v30 }
 0x24f   : > { %v1926_v39 = vpop.eup %1925  ;;  %v1321_v40 = vadd.f32 0.5, %v1257_v33  ;;  %1937 = vtanh.f32 %v1137_v34  ;;  %v1020_v41 = vpop.f32.mrf.mxu1 }
 0x250   : > { %v1322_v42 = vadd.f32 0.5, %v1258_v36  ;;  %v1259_v43 = vmul.f32 0.5, %v1926_v39  ;;  %1939 = vtanh.f32 %v1138_v37  ;;  %v1139_v44 = vmul.f32 0.5, %v1019_v38 }
 0x251   : > { %v1928_v45 = vpop.eup %1927  ;;  %1385 = vst [vmem:[%s2490_s13 + $0x80] sm:$0xff] %v1321_v40  ;;  %v1021_v46 = vadd.f32 %v1020_v41, %v2475_v31  ;;  %v1024_v47 = vpop.f32.mrf.mxu1 }
 0x252   : > { %1386 = vst [vmem:[%s2490_s13 + $0x88] sm:$0xff] %v1322_v42  ;;  %v1323_v48 = vadd.f32 0.5, %v1259_v43  ;;  %v1260_v50 = vmul.f32 0.5, %v1928_v45  ;;  %1941 = vtanh.f32 %v1139_v44  ;;  %v1025_v51 = vadd.f32 %v1024_v47, %v2473_v30 }
 0x253   : > { %v1930_v52 = vpop.eup %1929  ;;  %v1140_v53 = vmul.f32 0.5, %v1021_v46  ;;  %v1026_v54 = vpop.f32.mrf.mxu1 }
 0x254   : > { %1387 = vst [vmem:[%s2490_s13 + $0x90] sm:$0xff] %v1323_v48  ;;  %v1324_v55 = vadd.f32 0.5, %v1260_v50  ;;  %v1261_v56 = vmul.f32 0.5, %v1930_v52  ;;  %v1141_v57 = vmul.f32 0.5, %v1025_v51  ;;  %v1027_v58 = vadd.f32 %v1026_v54, %v2475_v31 }
 0x255   : > { %1943 = vtanh.f32 %v1140_v53  ;;  %v1028_v59 = vpop.f32.mrf.mxu1 }
 0x256   : > { %v1932_v60 = vpop.eup %1931  ;;  %1388 = vst [vmem:[%s2490_s13 + $0x98] sm:$0xff] %v1324_v55  ;;  %v1325_v61 = vadd.f32 0.5, %v1261_v56  ;;  %1945 = vtanh.f32 %v1141_v57  ;;  %v1142_v62 = vmul.f32 0.5, %v1027_v58  ;;  %v1029_v63 = vadd.f32 %v1028_v59, %v2473_v30 }
 0x257   : > { %v1934_v0 = vpop.eup %1933  ;;  %v1262_v1 = vmul.f32 0.5, %v1932_v60  ;;  %v1030_v3 = vpop.f32.mrf.mxu1 }
 0x258   : > { %1389 = vst [vmem:[%s2490_s13 + $0xa0] sm:$0xff] %v1325_v61  ;;  %v1263_v4 = vmul.f32 0.5, %v1934_v0  ;;  %1947 = vtanh.f32 %v1142_v62  ;;  %v1143_v5 = vmul.f32 0.5, %v1029_v63  ;;  %v1031_v6 = vadd.f32 %v1030_v3, %v2475_v31 }
 0x259   : > { %v1936_v7 = vpop.eup %1935  ;;  %v1326_v8 = vadd.f32 0.5, %v1262_v1  ;;  %v1034_v9 = vpop.f32.mrf.mxu1 }
 0x25a   : > { %v1327_v10 = vadd.f32 0.5, %v1263_v4  ;;  %v1264_v11 = vmul.f32 0.5, %v1936_v7  ;;  %1949 = vtanh.f32 %v1143_v5  ;;  %v1144_v12 = vmul.f32 0.5, %v1031_v6 }
 0x25b   : > { %1390 = vst [vmem:[%s2490_s13 + $0xa8] sm:$0xff] %v1326_v8  ;;  %v1035_v13 = vadd.f32 %v1034_v9, %v2473_v30  ;;  %v1036_v14 = vpop.f32.mrf.mxu1 }
 0x25c   : > { %v1938_v15 = vpop.eup %1937  ;;  %1391 = vst [vmem:[%s2490_s13 + $0xb0] sm:$0xff] %v1327_v10  ;;  %v1328_v16 = vadd.f32 0.5, %v1264_v11  ;;  %1951 = vtanh.f32 %v1144_v12  ;;  %v1037_v2 = vadd.f32 %v1036_v14, %v2475_v31 }
 0x25d   : > { %v1940_v17 = vpop.eup %1939  ;;  %v1265_v18 = vmul.f32 0.5, %v1938_v15  ;;  %v1145_v19 = vmul.f32 0.5, %v1035_v13  ;;  %v1038_v20 = vpop.f32.mrf.mxu1 }
 0x25e   : > { %1392 = vst [vmem:[%s2490_s13 + $0xb8] sm:$0xff] %v1328_v16  ;;  %v1266_v21 = vmul.f32 0.5, %v1940_v17  ;;  %v1146_v22 = vmul.f32 0.5, %v1037_v2  ;;  %v1039_v23 = vadd.f32 %v1038_v20, %v2473_v30 }
 0x25f   : > { %v1942_v24 = vpop.eup %1941  ;;  %v1329_v25 = vadd.f32 0.5, %v1265_v18  ;;  %1953 = vtanh.f32 %v1145_v19  ;;  %v1040_v26 = vpop.f32.mrf.mxu1 }
 0x260   : > { %v1330_v27 = vadd.f32 0.5, %v1266_v21  ;;  %v1267_v28 = vmul.f32 0.5, %v1942_v24  ;;  %1955 = vtanh.f32 %v1146_v22  ;;  %v1147_v29 = vmul.f32 0.5, %v1039_v23 }
 0x261   : > { %1393 = vst [vmem:[%s2490_s13 + $0xc0] sm:$0xff] %v1329_v25  ;;  %v1041_v32 = vadd.f32 %v1040_v26, %v2475_v31  ;;  %v1044_v49 = vpop.f32.mrf.mxu1 }
 0x262   : > { %v1944_v33 = vpop.eup %1943  ;;  %1394 = vst [vmem:[%s2490_s13 + $0xc8] sm:$0xff] %v1330_v27  ;;  %v1331_v34 = vadd.f32 0.5, %v1267_v28  ;;  %1957 = vtanh.f32 %v1147_v29  ;;  %v1045_v35 = vadd.f32 %v1044_v49, %v2473_v30 }
 0x263   : > { %v1946_v36 = vpop.eup %1945  ;;  %v1268_v37 = vmul.f32 0.5, %v1944_v33  ;;  %v1148_v38 = vmul.f32 0.5, %v1041_v32  ;;  %v1046_v39 = vpop.f32.mrf.mxu1 }
 0x264   : > { %1395 = vst [vmem:[%s2490_s13 + $0xd0] sm:$0xff] %v1331_v34  ;;  %v1269_v40 = vmul.f32 0.5, %v1946_v36  ;;  %v1149_v41 = vmul.f32 0.5, %v1045_v35  ;;  %v1047_v42 = vadd.f32 %v1046_v39, %v2475_v31 }
 0x265   : > { %v1948_v43 = vpop.eup %1947  ;;  %v1332_v44 = vadd.f32 0.5, %v1268_v37  ;;  %1959 = vtanh.f32 %v1148_v38  ;;  %v1048_v45 = vpop.f32.mrf.mxu1 }
 0x266   : > { %v1333_v46 = vadd.f32 0.5, %v1269_v40  ;;  %v1270_v47 = vmul.f32 0.5, %v1948_v43  ;;  %1961 = vtanh.f32 %v1149_v41  ;;  %v1150_v48 = vmul.f32 0.5, %v1047_v42 }
 0x267   : > { %v1950_v50 = vpop.eup %1949  ;;  %1396 = vst [vmem:[%s2490_s13 + $0xd8] sm:$0xff] %v1332_v44  ;;  %v1049_v51 = vadd.f32 %v1048_v45, %v2473_v30  ;;  %v1050_v52 = vpop.f32.mrf.mxu1 }
 0x268   : > { %1397 = vst [vmem:[%s2490_s13 + $0xe0] sm:$0xff] %v1333_v46  ;;  %v1334_v53 = vadd.f32 0.5, %v1270_v47  ;;  %v1271_v54 = vmul.f32 0.5, %v1950_v50  ;;  %1963 = vtanh.f32 %v1150_v48  ;;  %v1051_v55 = vadd.f32 %v1050_v52, %v2475_v31 }
 0x269   : > { %v1952_v56 = vpop.eup %1951  ;;  %v1151_v57 = vmul.f32 0.5, %v1049_v51  ;;  %v1054_v58 = vpop.f32.mrf.mxu1 }
 0x26a   : > { %1398 = vst [vmem:[%s2490_s13 + $0xe8] sm:$0xff] %v1334_v53  ;;  %v1335_v59 = vadd.f32 0.5, %v1271_v54  ;;  %v1272_v60 = vmul.f32 0.5, %v1952_v56  ;;  %v1152_v61 = vmul.f32 0.5, %v1051_v55  ;;  %v1055_v62 = vadd.f32 %v1054_v58, %v2473_v30 }
 0x26b   : > { %1965 = vtanh.f32 %v1151_v57  ;;  %v1056_v63 = vpop.f32.mrf.mxu1 }
 0x26c   : > { %v1954_v0 = vpop.eup %1953  ;;  %1399 = vst [vmem:[%s2490_s13 + $0xf0] sm:$0xff] %v1335_v59  ;;  %v1336_v1 = vadd.f32 0.5, %v1272_v60  ;;  %1967 = vtanh.f32 %v1152_v61  ;;  %v1153_v3 = vmul.f32 0.5, %v1055_v62  ;;  %v1057_v4 = vadd.f32 %v1056_v63, %v2475_v31 }
 0x26d   : > { %v1956_v5 = vpop.eup %1955  ;;  %v1273_v6 = vmul.f32 0.5, %v1954_v0  ;;  %v1058_v7 = vpop.f32.mrf.mxu1 }
 0x26e   : > { %1400 = vst [vmem:[%s2490_s13 + $0xf8] sm:$0xff] %v1336_v1  ;;  %v1274_v8 = vmul.f32 0.5, %v1956_v5  ;;  %1969 = vtanh.f32 %v1153_v3  ;;  %v1154_v9 = vmul.f32 0.5, %v1057_v4  ;;  %v1059_v10 = vadd.f32 %v1058_v7, %v2473_v30 }
 0x26f   : > { %v1958_v11 = vpop.eup %1957  ;;  %v1337_v12 = vadd.f32 0.5, %v1273_v6  ;;  %v1060_v13 = vpop.f32.mrf.mxu1 }
 0x270   : > { %v1338_v14 = vadd.f32 0.5, %v1274_v8  ;;  %v1275_v15 = vmul.f32 0.5, %v1958_v11  ;;  %1971 = vtanh.f32 %v1154_v9  ;;  %v1155_v16 = vmul.f32 0.5, %v1059_v10 }
 0x271   : > { %1401 = vst [vmem:[%s2490_s13 + $0x100] sm:$0xff] %v1337_v12  ;;  %v1061_v2 = vadd.f32 %v1060_v13, %v2475_v31  ;;  %v1064_v17 = vpop.f32.mrf.mxu1 }
 0x272   : > { %v1960_v18 = vpop.eup %1959  ;;  %1402 = vst [vmem:[%s2490_s13 + $0x108] sm:$0xff] %v1338_v14  ;;  %v1339_v19 = vadd.f32 0.5, %v1275_v15  ;;  %1973 = vtanh.f32 %v1155_v16  ;;  %v1065_v20 = vadd.f32 %v1064_v17, %v2473_v30 }
 0x273   : > { %v1962_v21 = vpop.eup %1961  ;;  %v1276_v22 = vmul.f32 0.5, %v1960_v18  ;;  %v1156_v23 = vmul.f32 0.5, %v1061_v2  ;;  %v1066_v24 = vpop.f32.mrf.mxu1 }
 0x274   : > { %1403 = vst [vmem:[%s2490_s13 + $0x110] sm:$0xff] %v1339_v19  ;;  %v1277_v25 = vmul.f32 0.5, %v1962_v21  ;;  %v1157_v26 = vmul.f32 0.5, %v1065_v20  ;;  %v1067_v27 = vadd.f32 %v1066_v24, %v2475_v31 }
 0x275   : > { %v1964_v28 = vpop.eup %1963  ;;  %v1340_v29 = vadd.f32 0.5, %v1276_v22  ;;  %1975 = vtanh.f32 %v1156_v23  ;;  %v1068_v32 = vpop.f32.mrf.mxu1 }
 0x276   : > { %v1341_v49 = vadd.f32 0.5, %v1277_v25  ;;  %v1278_v33 = vmul.f32 0.5, %v1964_v28  ;;  %1977 = vtanh.f32 %v1157_v26  ;;  %v1158_v34 = vmul.f32 0.5, %v1067_v27 }
 0x277   : > { %1404 = vst [vmem:[%s2490_s13 + $0x118] sm:$0xff] %v1340_v29  ;;  %v1069_v35 = vadd.f32 %v1068_v32, %v2473_v30  ;;  %v1070_v36 = vpop.f32.mrf.mxu1 }
 0x278   : > { %v1966_v37 = vpop.eup %1965  ;;  %1405 = vst [vmem:[%s2490_s13 + $0x120] sm:$0xff] %v1341_v49  ;;  %v1342_v38 = vadd.f32 0.5, %v1278_v33  ;;  %1979 = vtanh.f32 %v1158_v34  ;;  %v1071_v39 = vadd.f32 %v1070_v36, %v2475_v31 }
 0x279   : > { %v1968_v40 = vpop.eup %1967  ;;  %v1279_v41 = vmul.f32 0.5, %v1966_v37  ;;  %v1159_v42 = vmul.f32 0.5, %v1069_v35  ;;  %v1074_v43 = vpop.f32.mrf.mxu1 }
 0x27a   : > { %1406 = vst [vmem:[%s2490_s13 + $0x128] sm:$0xff] %v1342_v38  ;;  %v1280_v44 = vmul.f32 0.5, %v1968_v40  ;;  %v1160_v45 = vmul.f32 0.5, %v1071_v39  ;;  %v1075_v46 = vadd.f32 %v1074_v43, %v2473_v30 }
 0x27b   : > { %v1970_v47 = vpop.eup %1969  ;;  %v1343_v48 = vadd.f32 0.5, %v1279_v41  ;;  %1981 = vtanh.f32 %v1159_v42  ;;  %v1076_v50 = vpop.f32.mrf.mxu1 }
 0x27c   : > { %v1344_v51 = vadd.f32 0.5, %v1280_v44  ;;  %v1281_v52 = vmul.f32 0.5, %v1970_v47  ;;  %1983 = vtanh.f32 %v1160_v45  ;;  %v1161_v53 = vmul.f32 0.5, %v1075_v46 }
 0x27d   : > { %v1972_v54 = vpop.eup %1971  ;;  %1407 = vst [vmem:[%s2490_s13 + $0x130] sm:$0xff] %v1343_v48  ;;  %v1077_v55 = vadd.f32 %v1076_v50, %v2475_v31  ;;  %v1078_v56 = vpop.f32.mrf.mxu1 }
 0x27e   : > { %1408 = vst [vmem:[%s2490_s13 + $0x138] sm:$0xff] %v1344_v51  ;;  %v1345_v57 = vadd.f32 0.5, %v1281_v52  ;;  %v1282_v58 = vmul.f32 0.5, %v1972_v54  ;;  %1985 = vtanh.f32 %v1161_v53  ;;  %v1079_v59 = vadd.f32 %v1078_v56, %v2473_v30 }
 0x27f   : > { %v1974_v60 = vpop.eup %1973  ;;  %v1162_v61 = vmul.f32 0.5, %v1077_v55  ;;  %v1080_v62 = vpop.f32.mrf.mxu1 }
 0x280   : > { %1409 = vst [vmem:[%s2490_s13 + $0x140] sm:$0xff] %v1345_v57  ;;  %v1346_v63 = vadd.f32 0.5, %v1282_v58  ;;  %v1283_v0 = vmul.f32 0.5, %v1974_v60  ;;  %v1163_v1 = vmul.f32 0.5, %v1079_v59  ;;  %v1081_v3 = vadd.f32 %v1080_v62, %v2475_v31 }
 0x281   : > { %1987 = vtanh.f32 %v1162_v61  ;;  %v1084_v4 = vpop.f32.mrf.mxu1 }
 0x282   : > { %v1976_v5 = vpop.eup %1975  ;;  %1410 = vst [vmem:[%s2490_s13 + $0x148] sm:$0xff] %v1346_v63  ;;  %v1347_v6 = vadd.f32 0.5, %v1283_v0  ;;  %1989 = vtanh.f32 %v1163_v1  ;;  %v1164_v7 = vmul.f32 0.5, %v1081_v3  ;;  %v1085_v8 = vadd.f32 %v1084_v4, %v2473_v30 }
 0x283   : > { %v1978_v9 = vpop.eup %1977  ;;  %v1284_v10 = vmul.f32 0.5, %v1976_v5  ;;  %v1086_v11 = vpop.f32.mrf.mxu1 }
 0x284   : > { %1411 = vst [vmem:[%s2490_s13 + $0x150] sm:$0xff] %v1347_v6  ;;  %v1285_v12 = vmul.f32 0.5, %v1978_v9  ;;  %1991 = vtanh.f32 %v1164_v7  ;;  %v1165_v13 = vmul.f32 0.5, %v1085_v8  ;;  %v1087_v14 = vadd.f32 %v1086_v11, %v2475_v31 }
 0x285   : > { %v1980_v15 = vpop.eup %1979  ;;  %v1348_v16 = vadd.f32 0.5, %v1284_v10  ;;  %v1088_v2 = vpop.f32.mrf.mxu1 }
 0x286   : > { %v1349_v17 = vadd.f32 0.5, %v1285_v12  ;;  %v1286_v18 = vmul.f32 0.5, %v1980_v15  ;;  %1993 = vtanh.f32 %v1165_v13  ;;  %v1166_v19 = vmul.f32 0.5, %v1087_v14 }
 0x287   : > { %1412 = vst [vmem:[%s2490_s13 + $0x158] sm:$0xff] %v1348_v16  ;;  %v1089_v20 = vadd.f32 %v1088_v2, %v2473_v30  ;;  %v1090_v21 = vpop.f32.mrf.mxu1 }
 0x288   : > { %v1982_v22 = vpop.eup %1981  ;;  %1413 = vst [vmem:[%s2490_s13 + $0x160] sm:$0xff] %v1349_v17  ;;  %v1350_v23 = vadd.f32 0.5, %v1286_v18  ;;  %1995 = vtanh.f32 %v1166_v19  ;;  %v1091_v24 = vadd.f32 %v1090_v21, %v2475_v31 }
 0x289   : > { %v1984_v25 = vpop.eup %1983  ;;  %v1287_v26 = vmul.f32 0.5, %v1982_v22  ;;  %v1167_v27 = vmul.f32 0.5, %v1089_v20  ;;  %v1094_v28 = vpop.f32.mrf.mxu1 }
 0x28a   : > { %1414 = vst [vmem:[%s2490_s13 + $0x168] sm:$0xff] %v1350_v23  ;;  %v1288_v29 = vmul.f32 0.5, %v1984_v25  ;;  %v1168_v32 = vmul.f32 0.5, %v1091_v24  ;;  %v1095_v49 = vadd.f32 %v1094_v28, %v2473_v30 }
 0x28b   : > { %v1986_v33 = vpop.eup %1985  ;;  %v1351_v34 = vadd.f32 0.5, %v1287_v26  ;;  %1997 = vtanh.f32 %v1167_v27  ;;  %v1096_v35 = vpop.f32.mrf.mxu1 }
 0x28c   : > { %v1352_v36 = vadd.f32 0.5, %v1288_v29  ;;  %v1289_v37 = vmul.f32 0.5, %v1986_v33  ;;  %1999 = vtanh.f32 %v1168_v32  ;;  %v1169_v38 = vmul.f32 0.5, %v1095_v49 }
 0x28d   : > { %1415 = vst [vmem:[%s2490_s13 + $0x170] sm:$0xff] %v1351_v34  ;;  %v1097_v39 = vadd.f32 %v1096_v35, %v2475_v31  ;;  %v1098_v40 = vpop.f32.mrf.mxu1 }
 0x28e   : > { %v1988_v41 = vpop.eup %1987  ;;  %1416 = vst [vmem:[%s2490_s13 + $0x178] sm:$0xff] %v1352_v36  ;;  %v1353_v42 = vadd.f32 0.5, %v1289_v37  ;;  %2001 = vtanh.f32 %v1169_v38  ;;  %v1099_v43 = vadd.f32 %v1098_v40, %v2473_v30 }
 0x28f   : > { %v1990_v44 = vpop.eup %1989  ;;  %v1290_v45 = vmul.f32 0.5, %v1988_v41  ;;  %v1170_v46 = vmul.f32 0.5, %v1097_v39  ;;  %v1100_v47 = vpop.f32.mrf.mxu1 }
 0x290   : > { %1417 = vst [vmem:[%s2490_s13 + $0x180] sm:$0xff] %v1353_v42  ;;  %v1291_v48 = vmul.f32 0.5, %v1990_v44  ;;  %v1171_v50 = vmul.f32 0.5, %v1099_v43  ;;  %v1101_v51 = vadd.f32 %v1100_v47, %v2475_v31 }
 0x291   : > { %v1992_v52 = vpop.eup %1991  ;;  %v1354_v53 = vadd.f32 0.5, %v1290_v45  ;;  %2003 = vtanh.f32 %v1170_v46  ;;  %v1104_v54 = vpop.f32.mrf.mxu1 }
 0x292   : > { %v1355_v55 = vadd.f32 0.5, %v1291_v48  ;;  %v1292_v56 = vmul.f32 0.5, %v1992_v52  ;;  %2005 = vtanh.f32 %v1171_v50  ;;  %v1172_v57 = vmul.f32 0.5, %v1101_v51 }
 0x293   : > { %v1994_v58 = vpop.eup %1993  ;;  %1418 = vst [vmem:[%s2490_s13 + $0x188] sm:$0xff] %v1354_v53  ;;  %v1105_v59 = vadd.f32 %v1104_v54, %v2473_v30  ;;  %v1106_v60 = vpop.f32.mrf.mxu1 }
 0x294   : > { %1419 = vst [vmem:[%s2490_s13 + $0x190] sm:$0xff] %v1355_v55  ;;  %v1356_v61 = vadd.f32 0.5, %v1292_v56  ;;  %v1293_v62 = vmul.f32 0.5, %v1994_v58  ;;  %2007 = vtanh.f32 %v1172_v57  ;;  %v1107_v63 = vadd.f32 %v1106_v60, %v2475_v31 }
 0x295   : > { %v1996_v0 = vpop.eup %1995  ;;  %v1173_v1 = vmul.f32 0.5, %v1105_v59  ;;  %v1108_v3 = vpop.f32.mrf.mxu1 }
 0x296   : > { %1420 = vst [vmem:[%s2490_s13 + $0x198] sm:$0xff] %v1356_v61  ;;  %v1357_v4 = vadd.f32 0.5, %v1293_v62  ;;  %v1294_v5 = vmul.f32 0.5, %v1996_v0  ;;  %v1174_v6 = vmul.f32 0.5, %v1107_v63  ;;  %v1109_v7 = vadd.f32 %v1108_v3, %v2473_v30 }
 0x297   : > { %2009 = vtanh.f32 %v1173_v1  ;;  %v1110_v8 = vpop.f32.mrf.mxu1 }
 0x298   : > { %v1998_v9 = vpop.eup %1997  ;;  %1421 = vst [vmem:[%s2490_s13 + $0x1a0] sm:$0xff] %v1357_v4  ;;  %v1358_v10 = vadd.f32 0.5, %v1294_v5  ;;  %2011 = vtanh.f32 %v1174_v6  ;;  %v1175_v11 = vmul.f32 0.5, %v1109_v7  ;;  %v1111_v12 = vadd.f32 %v1110_v8, %v2475_v31 }
 0x299   : > { %v2000_v13 = vpop.eup %1999  ;;  %v1295_v14 = vmul.f32 0.5, %v1998_v9 }
 0x29a   : > { %1422 = vst [vmem:[%s2490_s13 + $0x1a8] sm:$0xff] %v1358_v10  ;;  %v1296_v15 = vmul.f32 0.5, %v2000_v13  ;;  %2013 = vtanh.f32 %v1175_v11  ;;  %v1176_v16 = vmul.f32 0.5, %v1111_v12 }
 0x29b   : > { %v2002_v2 = vpop.eup %2001  ;;  %v1359_v30 = vadd.f32 0.5, %v1295_v14 }
 0x29c   : > { %v1360_v17 = vadd.f32 0.5, %v1296_v15  ;;  %v1297_v18 = vmul.f32 0.5, %v2002_v2  ;;  %2015 = vtanh.f32 %v1176_v16 }
 0x29d   : > { %1423 = vst [vmem:[%s2490_s13 + $0x1b0] sm:$0xff] %v1359_v30 }
 0x29e   : > { %v2004_v19 = vpop.eup %2003  ;;  %1424 = vst [vmem:[%s2490_s13 + $0x1b8] sm:$0xff] %v1360_v17  ;;  %v1361_v20 = vadd.f32 0.5, %v1297_v18 }
 0x29f   : > { %v2006_v31 = vpop.eup %2005  ;;  %v1298_v21 = vmul.f32 0.5, %v2004_v19 }
 0x2a0   : > { %1425 = vst [vmem:[%s2490_s13 + $0x1c0] sm:$0xff] %v1361_v20  ;;  %v1299_v22 = vmul.f32 0.5, %v2006_v31 }
 0x2a1   : > { %v2008_v23 = vpop.eup %2007  ;;  %v1362_v24 = vadd.f32 0.5, %v1298_v21 }
 0x2a2   : > { %v1363_v25 = vadd.f32 0.5, %v1299_v22  ;;  %v1300_v26 = vmul.f32 0.5, %v2008_v23 }
 0x2a3   : > { %1426 = vst [vmem:[%s2490_s13 + $0x1c8] sm:$0xff] %v1362_v24 }
 0x2a4   : > { %v2010_v27 = vpop.eup %2009  ;;  %1427 = vst [vmem:[%s2490_s13 + $0x1d0] sm:$0xff] %v1363_v25  ;;  %v1364_v28 = vadd.f32 0.5, %v1300_v26 }
 0x2a5   : > { %v2012_v29 = vpop.eup %2011  ;;  %v1301_v32 = vmul.f32 0.5, %v2010_v27 }
 0x2a6   : > { %1428 = vst [vmem:[%s2490_s13 + $0x1d8] sm:$0xff] %v1364_v28  ;;  %v1302_v49 = vmul.f32 0.5, %v2012_v29 }
 0x2a7   : > { %v2014_v33 = vpop.eup %2013  ;;  %v1365_v34 = vadd.f32 0.5, %v1301_v32 }
 0x2a8   : > { %v1366_v35 = vadd.f32 0.5, %v1302_v49  ;;  %v1303_v36 = vmul.f32 0.5, %v2014_v33 }
 0x2a9   : > { %v2016_v37 = vpop.eup %2015  ;;  %1429 = vst [vmem:[%s2490_s13 + $0x1e0] sm:$0xff] %v1365_v34 }
 0x2aa   : > { %1430 = vst [vmem:[%s2490_s13 + $0x1e8] sm:$0xff] %v1366_v35  ;;  %v1367_v38 = vadd.f32 0.5, %v1303_v36  ;;  %v1304_v39 = vmul.f32 0.5, %v2016_v37 }
 0x2ac   : > { %1431 = vst [vmem:[%s2490_s13 + $0x1f0] sm:$0xff] %v1367_v38  ;;  %v1368_v40 = vadd.f32 0.5, %v1304_v39 }
 0x2ae   : > { %1432 = vst [vmem:[%s2490_s13 + $0x1f8] sm:$0xff] %v1368_v40 }
 0x2af   : > { %2110 = shalt.err (!%p2107_p9)
}
 0x2b0   : > { %s2111_s6 = scalar_lea.hbm %s2612_s11, 8192  ;;  %s2115_s10 = scalar_lea.hbm %s2664_s5, 16384 }
 0x2b1   : > { %p2112_p13 = scmp.ne.s32.totalorder %s2612_s11, %s2111_s6  ;;  %p2116_p4 = scmp.lt.s32.totalorder %s2612_s11, %s2664_s5 }
 0x2b2   : > { %p2117_p8 = scmp.lt.s32.totalorder %s2115_s10, %s2111_s6 }
 0x2b3   : > { %p2113_p5 = pnand %p2112_p13, %p2680_p10 }
 0x2b4   : > { %p2118_p7 = por %p2117_p8, %p2116_p4 }
 0x2b5   : > { %p2114_p0 = pneg %p2113_p5 }
 0x2b7   : > { %p2119_p11 = pnand %p2118_p7, %p2114_p0 }
 0x2b9   : > { %2122 = shalt.err (!%p2119_p11)
}
 0x2ba   : > { %s2178_s14 = smov 256   ;;  %s2179_s8 = smov 16  }
 0x2bb   : > { %1719 = dma.vmem_to_hbm [thread:$0]  (%p2680_p10), %s2614_s29, 8192, %s2612_s11, %s1434_s22, %s2178_s14, %s2178_s14, %s2179_s8  }
 0x2bc PF: > { %s1463_s9 = sand.u32 1, %s2153_s18   ;;  %p2681_p1 = scmp.ne.s32.totalorder %s2670_s25, 0 }
 0x2bd   : > { %p2682_p2 = scmp.ge.s32.totalorder %s2165_s21, 2  ;;  %s1464_s15 = scalar_lea.sflag [#allocation4], %s1463_s9 }
 0x2bf   : > { %p1733_p6 = pnand %p2682_p2, %p2681_p1 }
 0x2c1   : > { %p1734_p12 = pneg %p1733_p6 }
 0x2c3   : > { %2148 = dma.done.wait (%p1734_p12), %s1464_s15, 8192  }
 0x2c4   : > { %2150 = vsyncadd (%p1734_p12), %s1464_s15, 4294959104  ;;  %p19_p3 = scmp.ge.s32.totalorder %s2282_s17, 4   ;;  %s2683_s18 = smov %s2157_s19 }
 0x2c5   : > { %s2684_s19 = smov %s2161_s20  ;;  %s2685_s20 = smov %s2291_s28 }
 0x2c6   : > { %s2686_s21 = smov %s2282_s17  ;;  %21 = sbr.rel (!%p19_p3) target bundleno = 6 (0x6), region = 93 }
 0x2cb   :  { %1469 = vsyncpa [#allocation3], 1 }
 0x2cc   :  { %1471 = vsyncpa [#allocation3 + $0x1], 1 }
 0x2cd   :  { %1472 = vsyncpa [#allocation6], 1 }
 0x2ce   :  { %1473 = vsyncpa [#allocation4], 1 }
 0x2cf   :  { %1475 = vsyncpa [#allocation4 + $0x1], 1 }

</bundles_post_ra>
